<compile_context>
chip_gen: v7x
topology: tpu7x:2x2x1
jax: 0.10.0
libtpu: 0.0.40
codegen_flags: <defaults>
</compile_context>

<pallas_src>
import functools

import jax
import jax.numpy as jnp
from jax.experimental import pallas as pl
from jax.experimental.pallas import tpu as pltpu


def _layernorm(v, gamma, beta, eps=1e-5):
    mu = jnp.mean(v, axis=-1, keepdims=True)
    c = v - mu
    var = jnp.mean(c * c, axis=-1, keepdims=True)
    return c * jax.lax.rsqrt(var + eps) * gamma + beta


def encoder_layer_kernel(x_ref, mask_ref,
                         wqkv_ref, bqkv_ref,
                         wo_ref, bo_ref,
                         ln1_g_ref, ln1_b_ref,
                         w1_ref, b1_ref, w2_ref, b2_ref,
                         ln2_g_ref, ln2_b_ref,
                         out_ref,
                         *, head_num):
    TB, S, E = x_ref.shape
    hd = E // head_num
    M = TB * S

    x2d = x_ref[...].reshape(M, E).astype(jnp.float32)            # (M, E)

    # ---- fused QKV projection (bf16 MXU, f32 accumulate) --------------------
    # 1/sqrt(hd) is pre-folded into the Q columns of wqkv / bqkv on the host.
    qkv = jnp.dot(x2d.astype(jnp.bfloat16), wqkv_ref[...],
                  preferred_element_type=jnp.float32) + bqkv_ref[...]  # (M, 3E) f32
    qkv_bf = qkv.astype(jnp.bfloat16)                              # single cast

    # ---- head-major batching: (head_num * TB, S, hd) ------------------------
    def heads(part):
        cols = [qkv_bf[:, part * E + h * hd: part * E + (h + 1) * hd]
                .reshape(TB, S, hd) for h in range(head_num)]
        return jnp.concatenate(cols, axis=0)                       # (H*TB, S, hd)

    q, k, v = heads(0), heads(1), heads(2)

    # ---- attention: all heads in one batched dot -----------------------------
    s = jnp.einsum("bqd,bkd->bqk", q, k,
                   preferred_element_type=jnp.float32)             # (H*TB, S, S)
    # additive (TB, 1|S, S) mask: broadcast over heads / query rows inside the
    # add (stride-0 loads), never materialized at (TB, S, S).
    s = s.reshape(head_num, TB, S, S) + mask_ref[...].astype(jnp.float32)[None]
    s = s - jnp.max(s, axis=-1, keepdims=True)
    p = jnp.exp(s)
    p = p * pl.reciprocal(jnp.sum(p, axis=-1, keepdims=True))      # exact recip
    p = p.reshape(head_num * TB, S, S).astype(jnp.bfloat16)

    o = jnp.einsum("bqk,bkd->bqd", p, v,
                   preferred_element_type=jnp.float32)             # (H*TB, S, hd)
    o = o.astype(jnp.bfloat16)

    # ---- re-assemble heads, project with one full-K (M,E)@(E,E) matmul -------
    attn = jnp.concatenate([o[h * TB:(h + 1) * TB] for h in range(head_num)],
                           axis=-1)                                # (TB, S, E)
    attn = jnp.dot(attn.reshape(M, E), wo_ref[...],
                   preferred_element_type=jnp.float32) + bo_ref[...]

    # ---- residual + LayerNorm 1 (f32 stats) ----------------------------------
    y = _layernorm(x2d + attn, ln1_g_ref[...], ln1_b_ref[...])

    # ---- feed forward: bias + ReLU + bf16 cast fused in one pass -------------
    h1 = jnp.maximum(
        jnp.dot(y.astype(jnp.bfloat16), w1_ref[...],
                preferred_element_type=jnp.float32) + b1_ref[...],
        0.0).astype(jnp.bfloat16)
    h2 = jnp.dot(h1, w2_ref[...],
                 preferred_element_type=jnp.float32) + b2_ref[...]

    # ---- residual + LayerNorm 2 ----------------------------------------------
    z = _layernorm(y + h2, ln2_g_ref[...], ln2_b_ref[...])
    out_ref[...] = z.reshape(TB, S, E).astype(out_ref.dtype)


def _tpu_caps():
    """Per-generation (row_cap, vmem_limit_bytes, min_grid_steps)."""
    kind = ""
    try:
        kind = jax.devices()[0].device_kind.lower()
    except Exception:
        pass
    vmem_phys = None
    try:
        vmem_phys = int(pltpu.get_tpu_info().vmem_capacity_bytes)
    except Exception:
        pass
    if vmem_phys is None:
        # 128 MiB on v5e/v6e, 64 MiB on v7x; assume the smaller if unknown.
        vmem_phys = (128 if ("v5" in kind or "v6" in kind) else 64) * 1024 * 1024
    # leave ~25% headroom for Mosaic-internal scratch (~48 MiB v7x, ~96 MiB v5e/v6e)
    vmem_limit = min(int(vmem_phys * 3 // 4), 100 * 1024 * 1024)
    # v5e MXU (4x128^2) is filled at M=256; v6e/v7x (2x256^2) prefer 512.
    row_cap = 256 if "v5" in kind else 512
    # v7x has 2 TensorCores -> want >= 2 "parallel" grid steps.
    is_v7 = any(t in kind for t in ("v7", "tpu7", "7x"))
    return row_cap, vmem_limit, (2 if is_v7 else 1)


def _pick_batch_tile(batch, seq, row_cap, min_grid):
    """Largest divisor of `batch` with TB*S <= row_cap, preferring >= min_grid
    grid steps (megacore on v7x)."""
    divs = [d for d in range(1, batch + 1) if batch % d == 0]
    fits = [d for d in divs if d * seq <= row_cap] or [1]
    pref = [d for d in fits if batch // d >= min_grid]
    return max(pref) if pref else max(fits)


def transformer_encoder_layer(x, mask, params, *, head_num):
    """x: (B, S, E) float.  mask: additive float mask (B, 1, S) or (B, S, S)."""
    B, S, E = x.shape
    Hid = params["w1"].shape[1]
    hd = E // head_num
    Mq = mask.shape[1]
    scale = 1.0 / float(hd) ** 0.5

    f32 = lambda a: a.astype(jnp.float32)
    bf16 = lambda a: a.astype(jnp.bfloat16)

    # ---- host-side parameter packing: fused QKV, scale folded into Q ----------
    wqkv = bf16(jnp.concatenate(
        [params["wq"] * scale, params["wk"], params["wv"]], axis=1))     # (E, 3E)
    bqkv = f32(jnp.concatenate(
        [params["bq"] * scale, params["bk"], params["bv"]], axis=1))     # (1, 3E)
    wo, bo = bf16(params["wo"]), f32(params["bo"])
    ln1_g, ln1_b = f32(params["ln1_g"]), f32(params["ln1_b"])
    w1, b1 = bf16(params["w1"]), f32(params["b1"])
    w2, b2 = bf16(params["w2"]), f32(params["b2"])
    ln2_g, ln2_b = f32(params["ln2_g"]), f32(params["ln2_b"])

    row_cap, vmem_limit, min_grid = _tpu_caps()
    TB = _pick_batch_tile(B, S, row_cap, min_grid)
    grid = (B // TB,)

    # advisory cost estimate; weights are grid-invariant -> counted once
    flops = (2 * B * S * E * 3 * E            # fused QKV projection
             + 4 * B * head_num * S * S * hd  # QK^T + PV
             + 2 * B * S * E * E              # output projection
             + 4 * B * S * E * Hid)           # FFN
    param_bytes = sum(int(a.size) * a.dtype.itemsize for a in
                      (wqkv, bqkv, wo, bo, ln1_g, ln1_b, w1, b1, w2, b2,
                       ln2_g, ln2_b))
    io_bytes = (int(x.size) * x.dtype.itemsize
                + int(mask.size) * mask.dtype.itemsize
                + B * S * E * x.dtype.itemsize)
    cost = pl.CostEstimate(flops=int(flops),
                           transcendentals=int(B * head_num * S * S),
                           bytes_accessed=int(io_bytes + param_bytes))

    kernel = functools.partial(encoder_layer_kernel, head_num=head_num)

    def build(single_buffer_weights):
        def const_spec(shape, big=False):
            kwargs = {}
            if big and single_buffer_weights:
                # grid-invariant weight: no double buffering (VMEM headroom)
                kwargs["pipeline_mode"] = pl.Buffered(1)
            return pl.BlockSpec(shape, lambda b, _n=len(shape): (0,) * _n,
                                **kwargs)

        in_specs = [
            pl.BlockSpec((TB, S, E), lambda b: (b, 0, 0)),       # x
            pl.BlockSpec((TB, Mq, S), lambda b: (b, 0, 0)),      # additive mask
            const_spec((E, 3 * E), big=True), const_spec((1, 3 * E)),  # wqkv, bqkv
            const_spec((E, E), big=True), const_spec((1, E)),          # wo, bo
            const_spec((1, E)), const_spec((1, E)),                    # ln1 g, b
            const_spec((E, Hid), big=True), const_spec((1, Hid)),      # w1, b1
            const_spec((Hid, E), big=True), const_spec((1, E)),        # w2, b2
            const_spec((1, E)), const_spec((1, E)),                    # ln2 g, b
        ]
        return pl.pallas_call(
            kernel,
            out_shape=jax.ShapeDtypeStruct((B, S, E), x.dtype),
            grid=grid,
            in_specs=in_specs,
            out_specs=pl.BlockSpec((TB, S, E), lambda b: (b, 0, 0)),
            compiler_params=pltpu.CompilerParams(
                dimension_semantics=("parallel",),
                vmem_limit_bytes=vmem_limit),
            cost_estimate=cost,
        )

    args = (x, mask, wqkv, bqkv, wo, bo, ln1_g, ln1_b, w1, b1, w2, b2,
            ln2_g, ln2_b)
    try:
        return jax.block_until_ready(build(True)(*args))
    except Exception:
        # Fallback if this jax/Mosaic build rejects single-buffered inputs.
        return jax.block_until_ready(build(False)(*args))


def reference(x, mask, params, *, head_num):
    """Pure-JAX f32 reference for correctness checking."""
    B, S, E = x.shape
    hd = E // head_num
    q = x @ params["wq"] + params["bq"]
    k = x @ params["wk"] + params["bk"]
    v = x @ params["wv"] + params["bv"]
    q = q.reshape(B, S, head_num, hd).transpose(0, 2, 1, 3)
    k = k.reshape(B, S, head_num, hd).transpose(0, 2, 1, 3)
    v = v.reshape(B, S, head_num, hd).transpose(0, 2, 1, 3)
    s = jnp.einsum("bhqd,bhkd->bhqk", q, k) / jnp.sqrt(float(hd))
    s = s + mask[:, None, :, :]                     # (B,1,S) or (B,S,S) broadcast
    p = jax.nn.softmax(s, axis=-1)
    a = jnp.einsum("bhqk,bhkd->bhqd", p, v).transpose(0, 2, 1, 3).reshape(B, S, E)
    a = a @ params["wo"] + params["bo"]
    y = x + a
    y = (y - y.mean(-1, keepdims=True)) * jax.lax.rsqrt(
        y.var(-1, keepdims=True) + 1e-5) * params["ln1_g"] + params["ln1_b"]
    h1 = jnp.maximum(y @ params["w1"] + params["b1"], 0.0)
    h2 = h1 @ params["w2"] + params["b2"]
    z = y + h2
    z = (z - z.mean(-1, keepdims=True)) * jax.lax.rsqrt(
        z.var(-1, keepdims=True) + 1e-5) * params["ln2_g"] + params["ln2_b"]
    return z


if __name__ == "__main__":
    B, S, E, HEADS, HID = 2, 8, 32, 4, 64

    key = jax.random.PRNGKey(0)
    keys = jax.random.split(key, 14)

    def init(k, shape, scale=0.05):
        return jax.random.normal(k, shape, jnp.float32) * scale

    params = {
        "wq": init(keys[0], (E, E)), "bq": init(keys[1], (1, E)),
        "wk": init(keys[2], (E, E)), "bk": init(keys[3], (1, E)),
        "wv": init(keys[4], (E, E)), "bv": init(keys[5], (1, E)),
        "wo": init(keys[6], (E, E)), "bo": init(keys[7], (1, E)),
        "ln1_g": jnp.ones((1, E), jnp.float32),
        "ln1_b": jnp.zeros((1, E), jnp.float32),
        "w1": init(keys[8], (E, HID)), "b1": init(keys[9], (1, HID)),
        "w2": init(keys[10], (HID, E)), "b2": init(keys[11], (1, E)),
        "ln2_g": jnp.ones((1, E), jnp.float32),
        "ln2_b": jnp.zeros((1, E), jnp.float32),
    }

    x = jax.random.normal(keys[12], (B, S, E), jnp.float32)
    # compact additive key mask: (B, 1, S), 0.0 = attend, -1e9 = masked
    mask_bool = jax.random.bernoulli(keys[13], 0.2, (B, 1, S))
    mask = jnp.where(mask_bool, -1e9, 0.0).astype(jnp.float32)

    out = transformer_encoder_layer(x, mask, params, head_num=HEADS)
    out = jax.block_until_ready(out)

    ref = reference(x, mask, params, head_num=HEADS)
    assert out.shape == (B, S, E)
    # bf16 matmul operands -> relaxed tolerance vs f32 reference
    assert jnp.allclose(out, ref, atol=3e-2, rtol=3e-2), "mismatch vs reference"

    print("KERNEL_OK")
</pallas_src>

<mosaic_0001>
module attributes {stable_mosaic.version = 11 : i64} {
  func.func @encoder_layer_kernel(%arg0: i32, %arg1: memref<2x8x32xf32, #tpu.memory_space<vmem>>, %arg2: memref<2x1x8xf32, #tpu.memory_space<vmem>>, %arg3: memref<32x96xbf16, #tpu.memory_space<vmem>>, %arg4: memref<1x96xf32, #tpu.memory_space<vmem>>, %arg5: memref<32x32xbf16, #tpu.memory_space<vmem>>, %arg6: memref<1x32xf32, #tpu.memory_space<vmem>>, %arg7: memref<1x32xf32, #tpu.memory_space<vmem>>, %arg8: memref<1x32xf32, #tpu.memory_space<vmem>>, %arg9: memref<32x64xbf16, #tpu.memory_space<vmem>>, %arg10: memref<1x64xf32, #tpu.memory_space<vmem>>, %arg11: memref<64x32xbf16, #tpu.memory_space<vmem>>, %arg12: memref<1x32xf32, #tpu.memory_space<vmem>>, %arg13: memref<1x32xf32, #tpu.memory_space<vmem>>, %arg14: memref<1x32xf32, #tpu.memory_space<vmem>>, %arg15: memref<2x8x32xf32, #tpu.memory_space<vmem>>) attributes {dimension_semantics = [#tpu.dimension_semantics<parallel>], iteration_bounds = array<i64: 1>, scalar_prefetch = 0 : i64, scratch_operands = 0 : i64, tpu.core_type = #tpu.core_type<tc>, window_params = [{transform_indices = @transform_0, window_bounds = array<i64: 2, 8, 32>}, {transform_indices = @transform_1, window_bounds = array<i64: 2, 1, 8>}, {pipeline_mode = #tpu.pipeline_mode<synchronous>, transform_indices = @transform_2, window_bounds = array<i64: 32, 96>}, {pipeline_mode = #tpu.pipeline_mode<synchronous>, transform_indices = @transform_3, window_bounds = array<i64: 1, 96>}, {pipeline_mode = #tpu.pipeline_mode<synchronous>, transform_indices = @transform_4, window_bounds = array<i64: 32, 32>}, {pipeline_mode = #tpu.pipeline_mode<synchronous>, transform_indices = @transform_5, window_bounds = array<i64: 1, 32>}, {pipeline_mode = #tpu.pipeline_mode<synchronous>, transform_indices = @transform_6, window_bounds = array<i64: 1, 32>}, {pipeline_mode = #tpu.pipeline_mode<synchronous>, transform_indices = @transform_7, window_bounds = array<i64: 1, 32>}, {pipeline_mode = #tpu.pipeline_mode<synchronous>, transform_indices = @transform_8, window_bounds = array<i64: 32, 64>}, {pipeline_mode = #tpu.pipeline_mode<synchronous>, transform_indices = @transform_9, window_bounds = array<i64: 1, 64>}, {pipeline_mode = #tpu.pipeline_mode<synchronous>, transform_indices = @transform_10, window_bounds = array<i64: 64, 32>}, {pipeline_mode = #tpu.pipeline_mode<synchronous>, transform_indices = @transform_11, window_bounds = array<i64: 1, 32>}, {pipeline_mode = #tpu.pipeline_mode<synchronous>, transform_indices = @transform_12, window_bounds = array<i64: 1, 32>}, {pipeline_mode = #tpu.pipeline_mode<synchronous>, transform_indices = @transform_13, window_bounds = array<i64: 1, 32>}, {transform_indices = @transform_14, window_bounds = array<i64: 2, 8, 32>}]} {
    %c0 = arith.constant 0 : index
    %c0_0 = arith.constant 0 : index
    %c0_1 = arith.constant 0 : index
    %0 = vector.load %arg1[%c0, %c0_0, %c0_1] : memref<2x8x32xf32, #tpu.memory_space<vmem>>, vector<2x8x32xf32>
    %1 = vector.shape_cast %0 : vector<2x8x32xf32> to vector<16x32xf32>
    %2 = arith.truncf %1 : vector<16x32xf32> to vector<16x32xbf16>
    %c0_2 = arith.constant 0 : index
    %c0_3 = arith.constant 0 : index
    %3 = vector.load %arg3[%c0_2, %c0_3] : memref<32x96xbf16, #tpu.memory_space<vmem>>, vector<32x96xbf16>
    %cst = arith.constant dense<0.000000e+00> : vector<16x96xf32>
    %4 = tpu.matmul %2, %3, %cst {dimension_numbers = #tpu.dot_dimension_numbers<[1], [0], [0], [1], [0, 0, 1, 1], [], []>} : vector<16x32xbf16>, vector<32x96xbf16>, vector<16x96xf32> -> vector<16x96xf32>
    %c0_4 = arith.constant 0 : index
    %c0_5 = arith.constant 0 : index
    %5 = vector.load %arg4[%c0_4, %c0_5] : memref<1x96xf32, #tpu.memory_space<vmem>>, vector<1x96xf32>
    %6 = vector.broadcast %5 : vector<1x96xf32> to vector<16x96xf32>
    %7 = arith.addf %4, %6 : vector<16x96xf32>
    %8 = arith.truncf %7 : vector<16x96xf32> to vector<16x96xbf16>
    %9 = vector.extract_strided_slice %8 {offsets = [0, 0], sizes = [16, 8], strides = [1, 1]} : vector<16x96xbf16> to vector<16x8xbf16>
    %10 = vector.shape_cast %9 : vector<16x8xbf16> to vector<2x8x8xbf16>
    %11 = vector.extract_strided_slice %8 {offsets = [0, 8], sizes = [16, 8], strides = [1, 1]} : vector<16x96xbf16> to vector<16x8xbf16>
    %12 = vector.shape_cast %11 : vector<16x8xbf16> to vector<2x8x8xbf16>
    %13 = vector.extract_strided_slice %8 {offsets = [0, 16], sizes = [16, 8], strides = [1, 1]} : vector<16x96xbf16> to vector<16x8xbf16>
    %14 = vector.shape_cast %13 : vector<16x8xbf16> to vector<2x8x8xbf16>
    %15 = vector.extract_strided_slice %8 {offsets = [0, 24], sizes = [16, 8], strides = [1, 1]} : vector<16x96xbf16> to vector<16x8xbf16>
    %16 = vector.shape_cast %15 : vector<16x8xbf16> to vector<2x8x8xbf16>
    %17 = tpu.concatenate %10, %12, %14, %16 in 0 : vector<2x8x8xbf16>, vector<2x8x8xbf16>, vector<2x8x8xbf16>, vector<2x8x8xbf16> -> vector<8x8x8xbf16>
    %18 = vector.extract_strided_slice %8 {offsets = [0, 32], sizes = [16, 8], strides = [1, 1]} : vector<16x96xbf16> to vector<16x8xbf16>
    %19 = vector.shape_cast %18 : vector<16x8xbf16> to vector<2x8x8xbf16>
    %20 = vector.extract_strided_slice %8 {offsets = [0, 40], sizes = [16, 8], strides = [1, 1]} : vector<16x96xbf16> to vector<16x8xbf16>
    %21 = vector.shape_cast %20 : vector<16x8xbf16> to vector<2x8x8xbf16>
    %22 = vector.extract_strided_slice %8 {offsets = [0, 48], sizes = [16, 8], strides = [1, 1]} : vector<16x96xbf16> to vector<16x8xbf16>
    %23 = vector.shape_cast %22 : vector<16x8xbf16> to vector<2x8x8xbf16>
    %24 = vector.extract_strided_slice %8 {offsets = [0, 56], sizes = [16, 8], strides = [1, 1]} : vector<16x96xbf16> to vector<16x8xbf16>
    %25 = vector.shape_cast %24 : vector<16x8xbf16> to vector<2x8x8xbf16>
    %26 = tpu.concatenate %19, %21, %23, %25 in 0 : vector<2x8x8xbf16>, vector<2x8x8xbf16>, vector<2x8x8xbf16>, vector<2x8x8xbf16> -> vector<8x8x8xbf16>
    %27 = vector.extract_strided_slice %8 {offsets = [0, 64], sizes = [16, 8], strides = [1, 1]} : vector<16x96xbf16> to vector<16x8xbf16>
    %28 = vector.shape_cast %27 : vector<16x8xbf16> to vector<2x8x8xbf16>
    %29 = vector.extract_strided_slice %8 {offsets = [0, 72], sizes = [16, 8], strides = [1, 1]} : vector<16x96xbf16> to vector<16x8xbf16>
    %30 = vector.shape_cast %29 : vector<16x8xbf16> to vector<2x8x8xbf16>
    %31 = vector.extract_strided_slice %8 {offsets = [0, 80], sizes = [16, 8], strides = [1, 1]} : vector<16x96xbf16> to vector<16x8xbf16>
    %32 = vector.shape_cast %31 : vector<16x8xbf16> to vector<2x8x8xbf16>
    %33 = vector.extract_strided_slice %8 {offsets = [0, 88], sizes = [16, 8], strides = [1, 1]} : vector<16x96xbf16> to vector<16x8xbf16>
    %34 = vector.shape_cast %33 : vector<16x8xbf16> to vector<2x8x8xbf16>
    %35 = tpu.concatenate %28, %30, %32, %34 in 0 : vector<2x8x8xbf16>, vector<2x8x8xbf16>, vector<2x8x8xbf16>, vector<2x8x8xbf16> -> vector<8x8x8xbf16>
    "tpu.trace_start"() <{level = 10 : i32, message = "bqd,bkd->bqk"}> : () -> ()
    %cst_6 = arith.constant dense<0.000000e+00> : vector<8x8x8xf32>
    %36 = tpu.matmul %17, %26, %cst_6 {dimension_numbers = #tpu.dot_dimension_numbers<[2], [2], [1], [1], [0, 0, 0, 1, 1, 1], [0], [0]>} : vector<8x8x8xbf16>, vector<8x8x8xbf16>, vector<8x8x8xf32> -> vector<8x8x8xf32>
    "tpu.trace_stop"() : () -> ()
    %37 = vector.shape_cast %36 : vector<8x8x8xf32> to vector<4x2x8x8xf32>
    %c0_7 = arith.constant 0 : index
    %c0_8 = arith.constant 0 : index
    %c0_9 = arith.constant 0 : index
    %38 = vector.load %arg2[%c0_7, %c0_8, %c0_9] : memref<2x1x8xf32, #tpu.memory_space<vmem>>, vector<2x1x8xf32>
    %39 = vector.shape_cast %38 : vector<2x1x8xf32> to vector<1x2x1x8xf32>
    %40 = vector.broadcast %39 : vector<1x2x1x8xf32> to vector<4x2x8x8xf32>
    %41 = arith.addf %37, %40 : vector<4x2x8x8xf32>
    %cst_10 = arith.constant dense<0xFF800000> : vector<4x2x8xf32>
    %42 = vector.multi_reduction <maximumf>, %41, %cst_10 [3] : vector<4x2x8x8xf32> to vector<4x2x8xf32>
    %43 = vector.shape_cast %42 : vector<4x2x8xf32> to vector<4x2x8x1xf32>
    %44 = vector.broadcast %43 : vector<4x2x8x1xf32> to vector<4x2x8x8xf32>
    %45 = arith.subf %41, %44 : vector<4x2x8x8xf32>
    %46 = math.exp %45 : vector<4x2x8x8xf32>
    %cst_11 = arith.constant dense<0.000000e+00> : vector<4x2x8xf32>
    %47 = vector.multi_reduction <add>, %46, %cst_11 [3] : vector<4x2x8x8xf32> to vector<4x2x8xf32>
    %48 = vector.shape_cast %47 : vector<4x2x8xf32> to vector<4x2x8x1xf32>
    %49 = tpu.reciprocal %48 : vector<4x2x8x1xf32> -> vector<4x2x8x1xf32>
    %50 = vector.broadcast %49 : vector<4x2x8x1xf32> to vector<4x2x8x8xf32>
    %51 = arith.mulf %46, %50 : vector<4x2x8x8xf32>
    %52 = vector.shape_cast %51 : vector<4x2x8x8xf32> to vector<8x8x8xf32>
    %53 = arith.truncf %52 : vector<8x8x8xf32> to vector<8x8x8xbf16>
    "tpu.trace_start"() <{level = 10 : i32, message = "bqk,bkd->bqd"}> : () -> ()
    %cst_12 = arith.constant dense<0.000000e+00> : vector<8x8x8xf32>
    %54 = tpu.matmul %53, %35, %cst_12 {dimension_numbers = #tpu.dot_dimension_numbers<[2], [1], [1], [2], [0, 0, 0, 1, 1, 2], [0], [0]>} : vector<8x8x8xbf16>, vector<8x8x8xbf16>, vector<8x8x8xf32> -> vector<8x8x8xf32>
    "tpu.trace_stop"() : () -> ()
    %55 = arith.truncf %54 : vector<8x8x8xf32> to vector<8x8x8xbf16>
    %56 = vector.extract_strided_slice %55 {offsets = [0, 0, 0], sizes = [2, 8, 8], strides = [1, 1, 1]} : vector<8x8x8xbf16> to vector<2x8x8xbf16>
    %57 = vector.extract_strided_slice %55 {offsets = [2, 0, 0], sizes = [2, 8, 8], strides = [1, 1, 1]} : vector<8x8x8xbf16> to vector<2x8x8xbf16>
    %58 = vector.extract_strided_slice %55 {offsets = [4, 0, 0], sizes = [2, 8, 8], strides = [1, 1, 1]} : vector<8x8x8xbf16> to vector<2x8x8xbf16>
    %59 = vector.extract_strided_slice %55 {offsets = [6, 0, 0], sizes = [2, 8, 8], strides = [1, 1, 1]} : vector<8x8x8xbf16> to vector<2x8x8xbf16>
    %60 = tpu.concatenate %56, %57, %58, %59 in 2 : vector<2x8x8xbf16>, vector<2x8x8xbf16>, vector<2x8x8xbf16>, vector<2x8x8xbf16> -> vector<2x8x32xbf16>
    %61 = vector.shape_cast %60 : vector<2x8x32xbf16> to vector<16x32xbf16>
    %c0_13 = arith.constant 0 : index
    %c0_14 = arith.constant 0 : index
    %62 = vector.load %arg5[%c0_13, %c0_14] : memref<32x32xbf16, #tpu.memory_space<vmem>>, vector<32x32xbf16>
    %cst_15 = arith.constant dense<0.000000e+00> : vector<16x32xf32>
    %63 = tpu.matmul %61, %62, %cst_15 {dimension_numbers = #tpu.dot_dimension_numbers<[1], [0], [0], [1], [0, 0, 1, 1], [], []>} : vector<16x32xbf16>, vector<32x32xbf16>, vector<16x32xf32> -> vector<16x32xf32>
    %c0_16 = arith.constant 0 : index
    %c0_17 = arith.constant 0 : index
    %64 = vector.load %arg6[%c0_16, %c0_17] : memref<1x32xf32, #tpu.memory_space<vmem>>, vector<1x32xf32>
    %65 = vector.broadcast %64 : vector<1x32xf32> to vector<16x32xf32>
    %66 = arith.addf %63, %65 : vector<16x32xf32>
    %67 = arith.addf %1, %66 : vector<16x32xf32>
    %c0_18 = arith.constant 0 : index
    %c0_19 = arith.constant 0 : index
    %68 = vector.load %arg7[%c0_18, %c0_19] : memref<1x32xf32, #tpu.memory_space<vmem>>, vector<1x32xf32>
    %c0_20 = arith.constant 0 : index
    %c0_21 = arith.constant 0 : index
    %69 = vector.load %arg8[%c0_20, %c0_21] : memref<1x32xf32, #tpu.memory_space<vmem>>, vector<1x32xf32>
    %cst_22 = arith.constant dense<0.000000e+00> : vector<16xf32>
    %70 = vector.multi_reduction <add>, %67, %cst_22 [1] : vector<16x32xf32> to vector<16xf32>
    %71 = vector.shape_cast %70 : vector<16xf32> to vector<16x1xf32>
    %cst_23 = arith.constant 3.200000e+01 : f32
    %72 = vector.broadcast %cst_23 : f32 to vector<16x1xf32>
    %73 = arith.divf %71, %72 : vector<16x1xf32>
    %74 = vector.broadcast %73 : vector<16x1xf32> to vector<16x32xf32>
    %75 = arith.subf %67, %74 : vector<16x32xf32>
    %76 = arith.mulf %75, %75 : vector<16x32xf32>
    %cst_24 = arith.constant dense<0.000000e+00> : vector<16xf32>
    %77 = vector.multi_reduction <add>, %76, %cst_24 [1] : vector<16x32xf32> to vector<16xf32>
    %78 = vector.shape_cast %77 : vector<16xf32> to vector<16x1xf32>
    %cst_25 = arith.constant 3.200000e+01 : f32
    %79 = vector.broadcast %cst_25 : f32 to vector<16x1xf32>
    %80 = arith.divf %78, %79 : vector<16x1xf32>
    %cst_26 = arith.constant 9.99999974E-6 : f32
    %81 = vector.broadcast %cst_26 : f32 to vector<16x1xf32>
    %82 = arith.addf %80, %81 : vector<16x1xf32>
    %83 = math.rsqrt %82 : vector<16x1xf32>
    %84 = vector.broadcast %83 : vector<16x1xf32> to vector<16x32xf32>
    %85 = arith.mulf %75, %84 : vector<16x32xf32>
    %86 = vector.broadcast %68 : vector<1x32xf32> to vector<16x32xf32>
    %87 = arith.mulf %85, %86 : vector<16x32xf32>
    %88 = vector.broadcast %69 : vector<1x32xf32> to vector<16x32xf32>
    %89 = arith.addf %87, %88 : vector<16x32xf32>
    %90 = arith.truncf %89 : vector<16x32xf32> to vector<16x32xbf16>
    %c0_27 = arith.constant 0 : index
    %c0_28 = arith.constant 0 : index
    %91 = vector.load %arg9[%c0_27, %c0_28] : memref<32x64xbf16, #tpu.memory_space<vmem>>, vector<32x64xbf16>
    %cst_29 = arith.constant dense<0.000000e+00> : vector<16x64xf32>
    %92 = tpu.matmul %90, %91, %cst_29 {dimension_numbers = #tpu.dot_dimension_numbers<[1], [0], [0], [1], [0, 0, 1, 1], [], []>} : vector<16x32xbf16>, vector<32x64xbf16>, vector<16x64xf32> -> vector<16x64xf32>
    %c0_30 = arith.constant 0 : index
    %c0_31 = arith.constant 0 : index
    %93 = vector.load %arg10[%c0_30, %c0_31] : memref<1x64xf32, #tpu.memory_space<vmem>>, vector<1x64xf32>
    %94 = vector.broadcast %93 : vector<1x64xf32> to vector<16x64xf32>
    %95 = arith.addf %92, %94 : vector<16x64xf32>
    %cst_32 = arith.constant 0.000000e+00 : f32
    %96 = vector.broadcast %cst_32 : f32 to vector<16x64xf32>
    %97 = arith.maximumf %95, %96 : vector<16x64xf32>
    %98 = arith.truncf %97 : vector<16x64xf32> to vector<16x64xbf16>
    %c0_33 = arith.constant 0 : index
    %c0_34 = arith.constant 0 : index
    %99 = vector.load %arg11[%c0_33, %c0_34] : memref<64x32xbf16, #tpu.memory_space<vmem>>, vector<64x32xbf16>
    %cst_35 = arith.constant dense<0.000000e+00> : vector<16x32xf32>
    %100 = tpu.matmul %98, %99, %cst_35 {dimension_numbers = #tpu.dot_dimension_numbers<[1], [0], [0], [1], [0, 0, 1, 1], [], []>} : vector<16x64xbf16>, vector<64x32xbf16>, vector<16x32xf32> -> vector<16x32xf32>
    %c0_36 = arith.constant 0 : index
    %c0_37 = arith.constant 0 : index
    %101 = vector.load %arg12[%c0_36, %c0_37] : memref<1x32xf32, #tpu.memory_space<vmem>>, vector<1x32xf32>
    %102 = vector.broadcast %101 : vector<1x32xf32> to vector<16x32xf32>
    %103 = arith.addf %100, %102 : vector<16x32xf32>
    %104 = arith.addf %89, %103 : vector<16x32xf32>
    %c0_38 = arith.constant 0 : index
    %c0_39 = arith.constant 0 : index
    %105 = vector.load %arg13[%c0_38, %c0_39] : memref<1x32xf32, #tpu.memory_space<vmem>>, vector<1x32xf32>
    %c0_40 = arith.constant 0 : index
    %c0_41 = arith.constant 0 : index
    %106 = vector.load %arg14[%c0_40, %c0_41] : memref<1x32xf32, #tpu.memory_space<vmem>>, vector<1x32xf32>
    %cst_42 = arith.constant dense<0.000000e+00> : vector<16xf32>
    %107 = vector.multi_reduction <add>, %104, %cst_42 [1] : vector<16x32xf32> to vector<16xf32>
    %108 = vector.shape_cast %107 : vector<16xf32> to vector<16x1xf32>
    %cst_43 = arith.constant 3.200000e+01 : f32
    %109 = vector.broadcast %cst_43 : f32 to vector<16x1xf32>
    %110 = arith.divf %108, %109 : vector<16x1xf32>
    %111 = vector.broadcast %110 : vector<16x1xf32> to vector<16x32xf32>
    %112 = arith.subf %104, %111 : vector<16x32xf32>
    %113 = arith.mulf %112, %112 : vector<16x32xf32>
    %cst_44 = arith.constant dense<0.000000e+00> : vector<16xf32>
    %114 = vector.multi_reduction <add>, %113, %cst_44 [1] : vector<16x32xf32> to vector<16xf32>
    %115 = vector.shape_cast %114 : vector<16xf32> to vector<16x1xf32>
    %cst_45 = arith.constant 3.200000e+01 : f32
    %116 = vector.broadcast %cst_45 : f32 to vector<16x1xf32>
    %117 = arith.divf %115, %116 : vector<16x1xf32>
    %cst_46 = arith.constant 9.99999974E-6 : f32
    %118 = vector.broadcast %cst_46 : f32 to vector<16x1xf32>
    %119 = arith.addf %117, %118 : vector<16x1xf32>
    %120 = math.rsqrt %119 : vector<16x1xf32>
    %121 = vector.broadcast %120 : vector<16x1xf32> to vector<16x32xf32>
    %122 = arith.mulf %112, %121 : vector<16x32xf32>
    %123 = vector.broadcast %105 : vector<1x32xf32> to vector<16x32xf32>
    %124 = arith.mulf %122, %123 : vector<16x32xf32>
    %125 = vector.broadcast %106 : vector<1x32xf32> to vector<16x32xf32>
    %126 = arith.addf %124, %125 : vector<16x32xf32>
    %127 = vector.shape_cast %126 : vector<16x32xf32> to vector<2x8x32xf32>
    %c0_47 = arith.constant 0 : index
    %c0_48 = arith.constant 0 : index
    %c0_49 = arith.constant 0 : index
    %128 = vector.load %arg15[%c0_47, %c0_48, %c0_49] : memref<2x8x32xf32, #tpu.memory_space<vmem>>, vector<2x8x32xf32>
    tpu.vector_store %arg15[%c0_47, %c0_48, %c0_49], %127 {strides = array<i32>} : memref<2x8x32xf32, #tpu.memory_space<vmem>>, vector<2x8x32xf32>,
    return
  }
  func.func @transform_0(%arg0: i32) -> (i32, i32, i32) {
    %c0_i32 = arith.constant 0 : i32
    %c0_i32_0 = arith.constant 0 : i32
    %c0_i32_1 = arith.constant 0 : i32
    return %arg0, %c0_i32, %c0_i32_0 : i32, i32, i32
  }
  func.func @transform_1(%arg0: i32) -> (i32, i32, i32) {
    %c0_i32 = arith.constant 0 : i32
    %c0_i32_0 = arith.constant 0 : i32
    %c0_i32_1 = arith.constant 0 : i32
    return %arg0, %c0_i32, %c0_i32_0 : i32, i32, i32
  }
  func.func @transform_2(%arg0: i32) -> (i32, i32) {
    %c0_i32 = arith.constant 0 : i32
    %c0_i32_0 = arith.constant 0 : i32
    %c0_i32_1 = arith.constant 0 : i32
    return %c0_i32, %c0_i32_0 : i32, i32
  }
  func.func @transform_3(%arg0: i32) -> (i32, i32) {
    %c0_i32 = arith.constant 0 : i32
    %c0_i32_0 = arith.constant 0 : i32
    %c0_i32_1 = arith.constant 0 : i32
    return %c0_i32, %c0_i32_0 : i32, i32
  }
  func.func @transform_4(%arg0: i32) -> (i32, i32) {
    %c0_i32 = arith.constant 0 : i32
    %c0_i32_0 = arith.constant 0 : i32
    %c0_i32_1 = arith.constant 0 : i32
    return %c0_i32, %c0_i32_0 : i32, i32
  }
  func.func @transform_5(%arg0: i32) -> (i32, i32) {
    %c0_i32 = arith.constant 0 : i32
    %c0_i32_0 = arith.constant 0 : i32
    %c0_i32_1 = arith.constant 0 : i32
    return %c0_i32, %c0_i32_0 : i32, i32
  }
  func.func @transform_6(%arg0: i32) -> (i32, i32) {
    %c0_i32 = arith.constant 0 : i32
    %c0_i32_0 = arith.constant 0 : i32
    %c0_i32_1 = arith.constant 0 : i32
    return %c0_i32, %c0_i32_0 : i32, i32
  }
  func.func @transform_7(%arg0: i32) -> (i32, i32) {
    %c0_i32 = arith.constant 0 : i32
    %c0_i32_0 = arith.constant 0 : i32
    %c0_i32_1 = arith.constant 0 : i32
    return %c0_i32, %c0_i32_0 : i32, i32
  }
  func.func @transform_8(%arg0: i32) -> (i32, i32) {
    %c0_i32 = arith.constant 0 : i32
    %c0_i32_0 = arith.constant 0 : i32
    %c0_i32_1 = arith.constant 0 : i32
    return %c0_i32, %c0_i32_0 : i32, i32
  }
  func.func @transform_9(%arg0: i32) -> (i32, i32) {
    %c0_i32 = arith.constant 0 : i32
    %c0_i32_0 = arith.constant 0 : i32
    %c0_i32_1 = arith.constant 0 : i32
    return %c0_i32, %c0_i32_0 : i32, i32
  }
  func.func @transform_10(%arg0: i32) -> (i32, i32) {
    %c0_i32 = arith.constant 0 : i32
    %c0_i32_0 = arith.constant 0 : i32
    %c0_i32_1 = arith.constant 0 : i32
    return %c0_i32, %c0_i32_0 : i32, i32
  }
  func.func @transform_11(%arg0: i32) -> (i32, i32) {
    %c0_i32 = arith.constant 0 : i32
    %c0_i32_0 = arith.constant 0 : i32
    %c0_i32_1 = arith.constant 0 : i32
    return %c0_i32, %c0_i32_0 : i32, i32
  }
  func.func @transform_12(%arg0: i32) -> (i32, i32) {
    %c0_i32 = arith.constant 0 : i32
    %c0_i32_0 = arith.constant 0 : i32
    %c0_i32_1 = arith.constant 0 : i32
    return %c0_i32, %c0_i32_0 : i32, i32
  }
  func.func @transform_13(%arg0: i32) -> (i32, i32) {
    %c0_i32 = arith.constant 0 : i32
    %c0_i32_0 = arith.constant 0 : i32
    %c0_i32_1 = arith.constant 0 : i32
    return %c0_i32, %c0_i32_0 : i32, i32
  }
  func.func @transform_14(%arg0: i32) -> (i32, i32, i32) {
    %c0_i32 = arith.constant 0 : i32
    %c0_i32_0 = arith.constant 0 : i32
    %c0_i32_1 = arith.constant 0 : i32
    return %arg0, %c0_i32, %c0_i32_0 : i32, i32, i32
  }
}

module attributes {stable_mosaic.version = 11 : i64} {
  func.func @encoder_layer_kernel(%arg0: i32, %arg1: memref<2x8x32xf32, #tpu.memory_space<vmem>>, %arg2: memref<2x1x8xf32, #tpu.memory_space<vmem>>, %arg3: memref<32x96xbf16, #tpu.memory_space<vmem>>, %arg4: memref<1x96xf32, #tpu.memory_space<vmem>>, %arg5: memref<32x32xbf16, #tpu.memory_space<vmem>>, %arg6: memref<1x32xf32, #tpu.memory_space<vmem>>, %arg7: memref<1x32xf32, #tpu.memory_space<vmem>>, %arg8: memref<1x32xf32, #tpu.memory_space<vmem>>, %arg9: memref<32x64xbf16, #tpu.memory_space<vmem>>, %arg10: memref<1x64xf32, #tpu.memory_space<vmem>>, %arg11: memref<64x32xbf16, #tpu.memory_space<vmem>>, %arg12: memref<1x32xf32, #tpu.memory_space<vmem>>, %arg13: memref<1x32xf32, #tpu.memory_space<vmem>>, %arg14: memref<1x32xf32, #tpu.memory_space<vmem>>, %arg15: memref<2x8x32xf32, #tpu.memory_space<vmem>>) attributes {dimension_semantics = [#tpu.dimension_semantics<parallel>], iteration_bounds = array<i64: 1>, scalar_prefetch = 0 : i64, scratch_operands = 0 : i64, tpu.core_type = #tpu.core_type<tc>, window_params = [{transform_indices = @transform_0, window_bounds = array<i64: 2, 8, 32>}, {transform_indices = @transform_1, window_bounds = array<i64: 2, 1, 8>}, {pipeline_mode = #tpu.pipeline_mode<synchronous>, transform_indices = @transform_2, window_bounds = array<i64: 32, 96>}, {pipeline_mode = #tpu.pipeline_mode<synchronous>, transform_indices = @transform_3, window_bounds = array<i64: 1, 96>}, {pipeline_mode = #tpu.pipeline_mode<synchronous>, transform_indices = @transform_4, window_bounds = array<i64: 32, 32>}, {pipeline_mode = #tpu.pipeline_mode<synchronous>, transform_indices = @transform_5, window_bounds = array<i64: 1, 32>}, {pipeline_mode = #tpu.pipeline_mode<synchronous>, transform_indices = @transform_6, window_bounds = array<i64: 1, 32>}, {pipeline_mode = #tpu.pipeline_mode<synchronous>, transform_indices = @transform_7, window_bounds = array<i64: 1, 32>}, {pipeline_mode = #tpu.pipeline_mode<synchronous>, transform_indices = @transform_8, window_bounds = array<i64: 32, 64>}, {pipeline_mode = #tpu.pipeline_mode<synchronous>, transform_indices = @transform_9, window_bounds = array<i64: 1, 64>}, {pipeline_mode = #tpu.pipeline_mode<synchronous>, transform_indices = @transform_10, window_bounds = array<i64: 64, 32>}, {pipeline_mode = #tpu.pipeline_mode<synchronous>, transform_indices = @transform_11, window_bounds = array<i64: 1, 32>}, {pipeline_mode = #tpu.pipeline_mode<synchronous>, transform_indices = @transform_12, window_bounds = array<i64: 1, 32>}, {pipeline_mode = #tpu.pipeline_mode<synchronous>, transform_indices = @transform_13, window_bounds = array<i64: 1, 32>}, {transform_indices = @transform_14, window_bounds = array<i64: 2, 8, 32>}]} {
    %c0 = arith.constant 0 : index
    %c0_0 = arith.constant 0 : index
    %c0_1 = arith.constant 0 : index
    %0 = vector.load %arg1[%c0, %c0_0, %c0_1] : memref<2x8x32xf32, #tpu.memory_space<vmem>>, vector<2x8x32xf32>
    %1 = vector.shape_cast %0 : vector<2x8x32xf32> to vector<16x32xf32>
    %2 = arith.truncf %1 : vector<16x32xf32> to vector<16x32xbf16>
    %c0_2 = arith.constant 0 : index
    %c0_3 = arith.constant 0 : index
    %3 = vector.load %arg3[%c0_2, %c0_3] : memref<32x96xbf16, #tpu.memory_space<vmem>>, vector<32x96xbf16>
    %cst = arith.constant dense<0.000000e+00> : vector<16x96xf32>
    %4 = tpu.matmul %2, %3, %cst {dimension_numbers = #tpu.dot_dimension_numbers<[1], [0], [0], [1], [0, 0, 1, 1], [], []>} : vector<16x32xbf16>, vector<32x96xbf16>, vector<16x96xf32> -> vector<16x96xf32>
    %c0_4 = arith.constant 0 : index
    %c0_5 = arith.constant 0 : index
    %5 = vector.load %arg4[%c0_4, %c0_5] : memref<1x96xf32, #tpu.memory_space<vmem>>, vector<1x96xf32>
    %6 = vector.broadcast %5 : vector<1x96xf32> to vector<16x96xf32>
    %7 = arith.addf %4, %6 : vector<16x96xf32>
    %8 = arith.truncf %7 : vector<16x96xf32> to vector<16x96xbf16>
    %9 = vector.extract_strided_slice %8 {offsets = [0, 0], sizes = [16, 8], strides = [1, 1]} : vector<16x96xbf16> to vector<16x8xbf16>
    %10 = vector.shape_cast %9 : vector<16x8xbf16> to vector<2x8x8xbf16>
    %11 = vector.extract_strided_slice %8 {offsets = [0, 8], sizes = [16, 8], strides = [1, 1]} : vector<16x96xbf16> to vector<16x8xbf16>
    %12 = vector.shape_cast %11 : vector<16x8xbf16> to vector<2x8x8xbf16>
    %13 = vector.extract_strided_slice %8 {offsets = [0, 16], sizes = [16, 8], strides = [1, 1]} : vector<16x96xbf16> to vector<16x8xbf16>
    %14 = vector.shape_cast %13 : vector<16x8xbf16> to vector<2x8x8xbf16>
    %15 = vector.extract_strided_slice %8 {offsets = [0, 24], sizes = [16, 8], strides = [1, 1]} : vector<16x96xbf16> to vector<16x8xbf16>
    %16 = vector.shape_cast %15 : vector<16x8xbf16> to vector<2x8x8xbf16>
    %17 = tpu.concatenate %10, %12, %14, %16 in 0 : vector<2x8x8xbf16>, vector<2x8x8xbf16>, vector<2x8x8xbf16>, vector<2x8x8xbf16> -> vector<8x8x8xbf16>
    %18 = vector.extract_strided_slice %8 {offsets = [0, 32], sizes = [16, 8], strides = [1, 1]} : vector<16x96xbf16> to vector<16x8xbf16>
    %19 = vector.shape_cast %18 : vector<16x8xbf16> to vector<2x8x8xbf16>
    %20 = vector.extract_strided_slice %8 {offsets = [0, 40], sizes = [16, 8], strides = [1, 1]} : vector<16x96xbf16> to vector<16x8xbf16>
    %21 = vector.shape_cast %20 : vector<16x8xbf16> to vector<2x8x8xbf16>
    %22 = vector.extract_strided_slice %8 {offsets = [0, 48], sizes = [16, 8], strides = [1, 1]} : vector<16x96xbf16> to vector<16x8xbf16>
    %23 = vector.shape_cast %22 : vector<16x8xbf16> to vector<2x8x8xbf16>
    %24 = vector.extract_strided_slice %8 {offsets = [0, 56], sizes = [16, 8], strides = [1, 1]} : vector<16x96xbf16> to vector<16x8xbf16>
    %25 = vector.shape_cast %24 : vector<16x8xbf16> to vector<2x8x8xbf16>
    %26 = tpu.concatenate %19, %21, %23, %25 in 0 : vector<2x8x8xbf16>, vector<2x8x8xbf16>, vector<2x8x8xbf16>, vector<2x8x8xbf16> -> vector<8x8x8xbf16>
    %27 = vector.extract_strided_slice %8 {offsets = [0, 64], sizes = [16, 8], strides = [1, 1]} : vector<16x96xbf16> to vector<16x8xbf16>
    %28 = vector.shape_cast %27 : vector<16x8xbf16> to vector<2x8x8xbf16>
    %29 = vector.extract_strided_slice %8 {offsets = [0, 72], sizes = [16, 8], strides = [1, 1]} : vector<16x96xbf16> to vector<16x8xbf16>
    %30 = vector.shape_cast %29 : vector<16x8xbf16> to vector<2x8x8xbf16>
    %31 = vector.extract_strided_slice %8 {offsets = [0, 80], sizes = [16, 8], strides = [1, 1]} : vector<16x96xbf16> to vector<16x8xbf16>
    %32 = vector.shape_cast %31 : vector<16x8xbf16> to vector<2x8x8xbf16>
    %33 = vector.extract_strided_slice %8 {offsets = [0, 88], sizes = [16, 8], strides = [1, 1]} : vector<16x96xbf16> to vector<16x8xbf16>
    %34 = vector.shape_cast %33 : vector<16x8xbf16> to vector<2x8x8xbf16>
    %35 = tpu.concatenate %28, %30, %32, %34 in 0 : vector<2x8x8xbf16>, vector<2x8x8xbf16>, vector<2x8x8xbf16>, vector<2x8x8xbf16> -> vector<8x8x8xbf16>
    "tpu.trace_start"() <{level = 10 : i32, message = "bqd,bkd->bqk"}> : () -> ()
    %cst_6 = arith.constant dense<0.000000e+00> : vector<8x8x8xf32>
    %36 = tpu.matmul %17, %26, %cst_6 {dimension_numbers = #tpu.dot_dimension_numbers<[2], [2], [1], [1], [0, 0, 0, 1, 1, 1], [0], [0]>} : vector<8x8x8xbf16>, vector<8x8x8xbf16>, vector<8x8x8xf32> -> vector<8x8x8xf32>
    "tpu.trace_stop"() : () -> ()
    %37 = vector.shape_cast %36 : vector<8x8x8xf32> to vector<4x2x8x8xf32>
    %c0_7 = arith.constant 0 : index
    %c0_8 = arith.constant 0 : index
    %c0_9 = arith.constant 0 : index
    %38 = vector.load %arg2[%c0_7, %c0_8, %c0_9] : memref<2x1x8xf32, #tpu.memory_space<vmem>>, vector<2x1x8xf32>
    %39 = vector.shape_cast %38 : vector<2x1x8xf32> to vector<1x2x1x8xf32>
    %40 = vector.broadcast %39 : vector<1x2x1x8xf32> to vector<4x2x8x8xf32>
    %41 = arith.addf %37, %40 : vector<4x2x8x8xf32>
    %cst_10 = arith.constant dense<0xFF800000> : vector<4x2x8xf32>
    %42 = vector.multi_reduction <maximumf>, %41, %cst_10 [3] : vector<4x2x8x8xf32> to vector<4x2x8xf32>
    %43 = vector.shape_cast %42 : vector<4x2x8xf32> to vector<4x2x8x1xf32>
    %44 = vector.broadcast %43 : vector<4x2x8x1xf32> to vector<4x2x8x8xf32>
    %45 = arith.subf %41, %44 : vector<4x2x8x8xf32>
    %46 = math.exp %45 : vector<4x2x8x8xf32>
    %cst_11 = arith.constant dense<0.000000e+00> : vector<4x2x8xf32>
    %47 = vector.multi_reduction <add>, %46, %cst_11 [3] : vector<4x2x8x8xf32> to vector<4x2x8xf32>
    %48 = vector.shape_cast %47 : vector<4x2x8xf32> to vector<4x2x8x1xf32>
    %49 = tpu.reciprocal %48 : vector<4x2x8x1xf32> -> vector<4x2x8x1xf32>
    %50 = vector.broadcast %49 : vector<4x2x8x1xf32> to vector<4x2x8x8xf32>
    %51 = arith.mulf %46, %50 : vector<4x2x8x8xf32>
    %52 = vector.shape_cast %51 : vector<4x2x8x8xf32> to vector<8x8x8xf32>
    %53 = arith.truncf %52 : vector<8x8x8xf32> to vector<8x8x8xbf16>
    "tpu.trace_start"() <{level = 10 : i32, message = "bqk,bkd->bqd"}> : () -> ()
    %cst_12 = arith.constant dense<0.000000e+00> : vector<8x8x8xf32>
    %54 = tpu.matmul %53, %35, %cst_12 {dimension_numbers = #tpu.dot_dimension_numbers<[2], [1], [1], [2], [0, 0, 0, 1, 1, 2], [0], [0]>} : vector<8x8x8xbf16>, vector<8x8x8xbf16>, vector<8x8x8xf32> -> vector<8x8x8xf32>
    "tpu.trace_stop"() : () -> ()
    %55 = arith.truncf %54 : vector<8x8x8xf32> to vector<8x8x8xbf16>
    %56 = vector.extract_strided_slice %55 {offsets = [0, 0, 0], sizes = [2, 8, 8], strides = [1, 1, 1]} : vector<8x8x8xbf16> to vector<2x8x8xbf16>
    %57 = vector.extract_strided_slice %55 {offsets = [2, 0, 0], sizes = [2, 8, 8], strides = [1, 1, 1]} : vector<8x8x8xbf16> to vector<2x8x8xbf16>
    %58 = vector.extract_strided_slice %55 {offsets = [4, 0, 0], sizes = [2, 8, 8], strides = [1, 1, 1]} : vector<8x8x8xbf16> to vector<2x8x8xbf16>
    %59 = vector.extract_strided_slice %55 {offsets = [6, 0, 0], sizes = [2, 8, 8], strides = [1, 1, 1]} : vector<8x8x8xbf16> to vector<2x8x8xbf16>
    %60 = tpu.concatenate %56, %57, %58, %59 in 2 : vector<2x8x8xbf16>, vector<2x8x8xbf16>, vector<2x8x8xbf16>, vector<2x8x8xbf16> -> vector<2x8x32xbf16>
    %61 = vector.shape_cast %60 : vector<2x8x32xbf16> to vector<16x32xbf16>
    %c0_13 = arith.constant 0 : index
    %c0_14 = arith.constant 0 : index
    %62 = vector.load %arg5[%c0_13, %c0_14] : memref<32x32xbf16, #tpu.memory_space<vmem>>, vector<32x32xbf16>
    %cst_15 = arith.constant dense<0.000000e+00> : vector<16x32xf32>
    %63 = tpu.matmul %61, %62, %cst_15 {dimension_numbers = #tpu.dot_dimension_numbers<[1], [0], [0], [1], [0, 0, 1, 1], [], []>} : vector<16x32xbf16>, vector<32x32xbf16>, vector<16x32xf32> -> vector<16x32xf32>
    %c0_16 = arith.constant 0 : index
    %c0_17 = arith.constant 0 : index
    %64 = vector.load %arg6[%c0_16, %c0_17] : memref<1x32xf32, #tpu.memory_space<vmem>>, vector<1x32xf32>
    %65 = vector.broadcast %64 : vector<1x32xf32> to vector<16x32xf32>
    %66 = arith.addf %63, %65 : vector<16x32xf32>
    %67 = arith.addf %1, %66 : vector<16x32xf32>
    %c0_18 = arith.constant 0 : index
    %c0_19 = arith.constant 0 : index
    %68 = vector.load %arg7[%c0_18, %c0_19] : memref<1x32xf32, #tpu.memory_space<vmem>>, vector<1x32xf32>
    %c0_20 = arith.constant 0 : index
    %c0_21 = arith.constant 0 : index
    %69 = vector.load %arg8[%c0_20, %c0_21] : memref<1x32xf32, #tpu.memory_space<vmem>>, vector<1x32xf32>
    %cst_22 = arith.constant dense<0.000000e+00> : vector<16xf32>
    %70 = vector.multi_reduction <add>, %67, %cst_22 [1] : vector<16x32xf32> to vector<16xf32>
    %71 = vector.shape_cast %70 : vector<16xf32> to vector<16x1xf32>
    %cst_23 = arith.constant 3.200000e+01 : f32
    %72 = vector.broadcast %cst_23 : f32 to vector<16x1xf32>
    %73 = arith.divf %71, %72 : vector<16x1xf32>
    %74 = vector.broadcast %73 : vector<16x1xf32> to vector<16x32xf32>
    %75 = arith.subf %67, %74 : vector<16x32xf32>
    %76 = arith.mulf %75, %75 : vector<16x32xf32>
    %cst_24 = arith.constant dense<0.000000e+00> : vector<16xf32>
    %77 = vector.multi_reduction <add>, %76, %cst_24 [1] : vector<16x32xf32> to vector<16xf32>
    %78 = vector.shape_cast %77 : vector<16xf32> to vector<16x1xf32>
    %cst_25 = arith.constant 3.200000e+01 : f32
    %79 = vector.broadcast %cst_25 : f32 to vector<16x1xf32>
    %80 = arith.divf %78, %79 : vector<16x1xf32>
    %cst_26 = arith.constant 9.99999974E-6 : f32
    %81 = vector.broadcast %cst_26 : f32 to vector<16x1xf32>
    %82 = arith.addf %80, %81 : vector<16x1xf32>
    %83 = math.rsqrt %82 : vector<16x1xf32>
    %84 = vector.broadcast %83 : vector<16x1xf32> to vector<16x32xf32>
    %85 = arith.mulf %75, %84 : vector<16x32xf32>
    %86 = vector.broadcast %68 : vector<1x32xf32> to vector<16x32xf32>
    %87 = arith.mulf %85, %86 : vector<16x32xf32>
    %88 = vector.broadcast %69 : vector<1x32xf32> to vector<16x32xf32>
    %89 = arith.addf %87, %88 : vector<16x32xf32>
    %90 = arith.truncf %89 : vector<16x32xf32> to vector<16x32xbf16>
    %c0_27 = arith.constant 0 : index
    %c0_28 = arith.constant 0 : index
    %91 = vector.load %arg9[%c0_27, %c0_28] : memref<32x64xbf16, #tpu.memory_space<vmem>>, vector<32x64xbf16>
    %cst_29 = arith.constant dense<0.000000e+00> : vector<16x64xf32>
    %92 = tpu.matmul %90, %91, %cst_29 {dimension_numbers = #tpu.dot_dimension_numbers<[1], [0], [0], [1], [0, 0, 1, 1], [], []>} : vector<16x32xbf16>, vector<32x64xbf16>, vector<16x64xf32> -> vector<16x64xf32>
    %c0_30 = arith.constant 0 : index
    %c0_31 = arith.constant 0 : index
    %93 = vector.load %arg10[%c0_30, %c0_31] : memref<1x64xf32, #tpu.memory_space<vmem>>, vector<1x64xf32>
    %94 = vector.broadcast %93 : vector<1x64xf32> to vector<16x64xf32>
    %95 = arith.addf %92, %94 : vector<16x64xf32>
    %cst_32 = arith.constant 0.000000e+00 : f32
    %96 = vector.broadcast %cst_32 : f32 to vector<16x64xf32>
    %97 = arith.maximumf %95, %96 : vector<16x64xf32>
    %98 = arith.truncf %97 : vector<16x64xf32> to vector<16x64xbf16>
    %c0_33 = arith.constant 0 : index
    %c0_34 = arith.constant 0 : index
    %99 = vector.load %arg11[%c0_33, %c0_34] : memref<64x32xbf16, #tpu.memory_space<vmem>>, vector<64x32xbf16>
    %cst_35 = arith.constant dense<0.000000e+00> : vector<16x32xf32>
    %100 = tpu.matmul %98, %99, %cst_35 {dimension_numbers = #tpu.dot_dimension_numbers<[1], [0], [0], [1], [0, 0, 1, 1], [], []>} : vector<16x64xbf16>, vector<64x32xbf16>, vector<16x32xf32> -> vector<16x32xf32>
    %c0_36 = arith.constant 0 : index
    %c0_37 = arith.constant 0 : index
    %101 = vector.load %arg12[%c0_36, %c0_37] : memref<1x32xf32, #tpu.memory_space<vmem>>, vector<1x32xf32>
    %102 = vector.broadcast %101 : vector<1x32xf32> to vector<16x32xf32>
    %103 = arith.addf %100, %102 : vector<16x32xf32>
    %104 = arith.addf %89, %103 : vector<16x32xf32>
    %c0_38 = arith.constant 0 : index
    %c0_39 = arith.constant 0 : index
    %105 = vector.load %arg13[%c0_38, %c0_39] : memref<1x32xf32, #tpu.memory_space<vmem>>, vector<1x32xf32>
    %c0_40 = arith.constant 0 : index
    %c0_41 = arith.constant 0 : index
    %106 = vector.load %arg14[%c0_40, %c0_41] : memref<1x32xf32, #tpu.memory_space<vmem>>, vector<1x32xf32>
    %cst_42 = arith.constant dense<0.000000e+00> : vector<16xf32>
    %107 = vector.multi_reduction <add>, %104, %cst_42 [1] : vector<16x32xf32> to vector<16xf32>
    %108 = vector.shape_cast %107 : vector<16xf32> to vector<16x1xf32>
    %cst_43 = arith.constant 3.200000e+01 : f32
    %109 = vector.broadcast %cst_43 : f32 to vector<16x1xf32>
    %110 = arith.divf %108, %109 : vector<16x1xf32>
    %111 = vector.broadcast %110 : vector<16x1xf32> to vector<16x32xf32>
    %112 = arith.subf %104, %111 : vector<16x32xf32>
    %113 = arith.mulf %112, %112 : vector<16x32xf32>
    %cst_44 = arith.constant dense<0.000000e+00> : vector<16xf32>
    %114 = vector.multi_reduction <add>, %113, %cst_44 [1] : vector<16x32xf32> to vector<16xf32>
    %115 = vector.shape_cast %114 : vector<16xf32> to vector<16x1xf32>
    %cst_45 = arith.constant 3.200000e+01 : f32
    %116 = vector.broadcast %cst_45 : f32 to vector<16x1xf32>
    %117 = arith.divf %115, %116 : vector<16x1xf32>
    %cst_46 = arith.constant 9.99999974E-6 : f32
    %118 = vector.broadcast %cst_46 : f32 to vector<16x1xf32>
    %119 = arith.addf %117, %118 : vector<16x1xf32>
    %120 = math.rsqrt %119 : vector<16x1xf32>
    %121 = vector.broadcast %120 : vector<16x1xf32> to vector<16x32xf32>
    %122 = arith.mulf %112, %121 : vector<16x32xf32>
    %123 = vector.broadcast %105 : vector<1x32xf32> to vector<16x32xf32>
    %124 = arith.mulf %122, %123 : vector<16x32xf32>
    %125 = vector.broadcast %106 : vector<1x32xf32> to vector<16x32xf32>
    %126 = arith.addf %124, %125 : vector<16x32xf32>
    %127 = vector.shape_cast %126 : vector<16x32xf32> to vector<2x8x32xf32>
    %c0_47 = arith.constant 0 : index
    %c0_48 = arith.constant 0 : index
    %c0_49 = arith.constant 0 : index
    %128 = vector.load %arg15[%c0_47, %c0_48, %c0_49] : memref<2x8x32xf32, #tpu.memory_space<vmem>>, vector<2x8x32xf32>
    tpu.vector_store %arg15[%c0_47, %c0_48, %c0_49], %127 {strides = array<i32>} : memref<2x8x32xf32, #tpu.memory_space<vmem>>, vector<2x8x32xf32>,
    return
  }
  func.func @transform_0(%arg0: i32) -> (i32, i32, i32) {
    %c0_i32 = arith.constant 0 : i32
    %c0_i32_0 = arith.constant 0 : i32
    %c0_i32_1 = arith.constant 0 : i32
    return %arg0, %c0_i32, %c0_i32_0 : i32, i32, i32
  }
  func.func @transform_1(%arg0: i32) -> (i32, i32, i32) {
    %c0_i32 = arith.constant 0 : i32
    %c0_i32_0 = arith.constant 0 : i32
    %c0_i32_1 = arith.constant 0 : i32
    return %arg0, %c0_i32, %c0_i32_0 : i32, i32, i32
  }
  func.func @transform_2(%arg0: i32) -> (i32, i32) {
    %c0_i32 = arith.constant 0 : i32
    %c0_i32_0 = arith.constant 0 : i32
    %c0_i32_1 = arith.constant 0 : i32
    return %c0_i32, %c0_i32_0 : i32, i32
  }
  func.func @transform_3(%arg0: i32) -> (i32, i32) {
    %c0_i32 = arith.constant 0 : i32
    %c0_i32_0 = arith.constant 0 : i32
    %c0_i32_1 = arith.constant 0 : i32
    return %c0_i32, %c0_i32_0 : i32, i32
  }
  func.func @transform_4(%arg0: i32) -> (i32, i32) {
    %c0_i32 = arith.constant 0 : i32
    %c0_i32_0 = arith.constant 0 : i32
    %c0_i32_1 = arith.constant 0 : i32
    return %c0_i32, %c0_i32_0 : i32, i32
  }
  func.func @transform_5(%arg0: i32) -> (i32, i32) {
    %c0_i32 = arith.constant 0 : i32
    %c0_i32_0 = arith.constant 0 : i32
    %c0_i32_1 = arith.constant 0 : i32
    return %c0_i32, %c0_i32_0 : i32, i32
  }
  func.func @transform_6(%arg0: i32) -> (i32, i32) {
    %c0_i32 = arith.constant 0 : i32
    %c0_i32_0 = arith.constant 0 : i32
    %c0_i32_1 = arith.constant 0 : i32
    return %c0_i32, %c0_i32_0 : i32, i32
  }
  func.func @transform_7(%arg0: i32) -> (i32, i32) {
    %c0_i32 = arith.constant 0 : i32
    %c0_i32_0 = arith.constant 0 : i32
    %c0_i32_1 = arith.constant 0 : i32
    return %c0_i32, %c0_i32_0 : i32, i32
  }
  func.func @transform_8(%arg0: i32) -> (i32, i32) {
    %c0_i32 = arith.constant 0 : i32
    %c0_i32_0 = arith.constant 0 : i32
    %c0_i32_1 = arith.constant 0 : i32
    return %c0_i32, %c0_i32_0 : i32, i32
  }
  func.func @transform_9(%arg0: i32) -> (i32, i32) {
    %c0_i32 = arith.constant 0 : i32
    %c0_i32_0 = arith.constant 0 : i32
    %c0_i32_1 = arith.constant 0 : i32
    return %c0_i32, %c0_i32_0 : i32, i32
  }
  func.func @transform_10(%arg0: i32) -> (i32, i32) {
    %c0_i32 = arith.constant 0 : i32
    %c0_i32_0 = arith.constant 0 : i32
    %c0_i32_1 = arith.constant 0 : i32
    return %c0_i32, %c0_i32_0 : i32, i32
  }
  func.func @transform_11(%arg0: i32) -> (i32, i32) {
    %c0_i32 = arith.constant 0 : i32
    %c0_i32_0 = arith.constant 0 : i32
    %c0_i32_1 = arith.constant 0 : i32
    return %c0_i32, %c0_i32_0 : i32, i32
  }
  func.func @transform_12(%arg0: i32) -> (i32, i32) {
    %c0_i32 = arith.constant 0 : i32
    %c0_i32_0 = arith.constant 0 : i32
    %c0_i32_1 = arith.constant 0 : i32
    return %c0_i32, %c0_i32_0 : i32, i32
  }
  func.func @transform_13(%arg0: i32) -> (i32, i32) {
    %c0_i32 = arith.constant 0 : i32
    %c0_i32_0 = arith.constant 0 : i32
    %c0_i32_1 = arith.constant 0 : i32
    return %c0_i32, %c0_i32_0 : i32, i32
  }
  func.func @transform_14(%arg0: i32) -> (i32, i32, i32) {
    %c0_i32 = arith.constant 0 : i32
    %c0_i32_0 = arith.constant 0 : i32
    %c0_i32_1 = arith.constant 0 : i32
    return %arg0, %c0_i32, %c0_i32_0 : i32, i32, i32
  }
}

</mosaic_0001>

<bundles_post_ra>
// kernel: tpu_custom_call.1
= control target key start
LH: loop header
LB: loop body
LE: loop exit
PB: predicated region body
PF: predicated region fallthrough
CT: control target
= control target key end

     0   :  { %19 = vsyncpa [#allocation3], 0  ;;  %s2169_s0 = inlined_call_operand.vmem [shape: f32[2,8,32], index: 0, kind: input, shape index: {}]   ;;  %s2170_s1 = inlined_call_operand.vmem [shape: f32[2,1,8], index: 1, kind: input, shape index: {}]   ;;  %s2171_s2 = inlined_call_operand.vmem [shape: bf16[32,96], index: 2, kind: input, shape index: {}]   ;;  %s2172_s3 = inlined_call_operand.vmem [shape: f32[1,96], index: 3, kind: input, shape index: {}]   ;;  %s2173_s4 = inlined_call_operand.vmem [shape: bf16[32,32], index: 4, kind: input, shape index: {}]   ;;  %s2174_s5 = inlined_call_operand.vmem [shape: f32[1,32], index: 5, kind: input, shape index: {}]   ;;  %s2175_s6 = inlined_call_operand.vmem [shape: f32[1,32], index: 6, kind: input, shape index: {}]   ;;  %s2176_s7 = inlined_call_operand.vmem [shape: f32[1,32], index: 7, kind: input, shape index: {}]   ;;  %s2177_s8 = inlined_call_operand.hbm [shape: bf16[32,64], index: 8, kind: input, shape index: {}]   ;;  %s2178_s9 = inlined_call_operand.vmem [shape: f32[1,64], index: 9, kind: input, shape index: {}]   ;;  %s2179_s10 = inlined_call_operand.vmem [shape: bf16[64,32], index: 10, kind: input, shape index: {}]   ;;  %s2180_s11 = inlined_call_operand.vmem [shape: f32[1,32], index: 11, kind: input, shape index: {}]   ;;  %s2181_s12 = inlined_call_operand.vmem [shape: f32[1,32], index: 12, kind: input, shape index: {}]   ;;  %s2182_s13 = inlined_call_operand.vmem [shape: f32[1,32], index: 13, kind: input, shape index: {}]   ;;  %s2183_s14 = inlined_call_operand.hbm [shape: f32[2,8,32], index: 14, kind: output, shape index: {}]  }
   0x1   :  { %20 = vsyncpa [#allocation4], 0  ;;  %s1774_s29 = smov [#allocation2]   ;;  %s1726_s17 = scalar_lea.hbm %s2177_s8, 256 }
   0x2   :  { %s42_s30 = sshll.u32 %s1774_s29, 4  ;;  %p1727_p0 = scmp.ne.s32.totalorder %s2177_s8, %s1726_s17  ;;  %s43_s30 = int_to_ptr.vmem [resolvable:$true] %s42_s30 }
   0x3   :  { %p1730_p1 = scmp.lt.u32.totalorder %s1726_s17, %s2177_s8 }
   0x5   :  { %p1732_p2 = pnand %p1730_p1, %p1727_p0 }
   0x7   :  { %1735 = shalt.err (!%p1732_p2)
}
   0x8   :  { %s1736_s22 = scalar_lea.vmem %s43_s30, 256  ;;  %p1741_p4 = scmp.lt.s32.totalorder %s43_s30, %s43_s30 }
   0x9   :  { %p1737_p3 = scmp.ne.s32.totalorder %s43_s30, %s1736_s22  ;;  %p1742_p5 = scmp.lt.s32.totalorder %s1736_s22, %s1736_s22 }
   0xb   :  { %p1743_p6 = por %p1742_p5, %p1741_p4 }
   0xd   :  { %p1744_p7 = pnand %p1743_p6, %p1737_p3 }
   0xf   :  { %1747 = shalt.err (!%p1744_p7)
}
  0x10   :  { %s1775_s23 = smov 64   ;;  %s1776_s24 = smov 4  }
  0x11   :  { %48 = dma.hbm_to_vmem [thread:$0]  %s2177_s8, 256, %s43_s30, [#allocation3], %s1775_s23, %s1775_s23, %s1776_s24  }
  0x12   :  { %1770 = dma.done.wait [#allocation3], 256  }
  0x13   :  { %1771 = vsyncadd [#allocation3], 4294967040  ;;  %v1777_v0 = vmov 0.0   ;;  %vm1778_vm0 = vmmov 0   ;;  %v1676_v1 = vld [vmem:[%s2171_s2] sm:$0xff]   ;;  %v1677_v2 = vld [vmem:[%s2171_s2 + $0x8] sm:$0xff]  }
  0x14   :  { %1530 = vmatprep.subr.bf16.mxu0 %v1777_v0  ;;  %1534 = vmatprep.mubr.msk.bf16.mxu0 %vm1778_vm0, %v1777_v0  ;;  %v1892_v3 = vld [vmem:[%s2169_s0] sm:$0xff]  ;;  %v1897_v4 = vld [vmem:[%s2169_s0 + $0x8] sm:$0xff]  ;;  %vm89_vm1 = vcmask 261120   ;;  %s1779_s0 = smov 112   ;;  %s1780_s19 = smov 120   ;;  %vm154_vm2 = vcmask 64512  }
  0x15   :  { %1538 = vmatprep.subr.bf16.mxu1 %v1777_v0  ;;  %1540 = vmatprep.mubr.msk.bf16.mxu1 %vm1778_vm0, %v1777_v0  ;;  %v65_v5 = vpack.c.bf16 %v1897_v4, %v1892_v3  ;;  %v1433_v6 = vld [vmem:[%s2172_s3] ss:$0 sm:$0xff]  ;;  %s1781_s20 = smov 104   ;;  %s1782_s3 = smov 96   ;;  %vm672_vm3 = vcmask 1043456   ;;  %vm1084_vm4 = vcmask 130048  }
  0x16   :  { %1531 = vmatpush3.bf16.msra.mxu0 %v1676_v1  ;;  %v1453_v45 = vld [vmem:[%s2170_s1] ss:$0 sm:$0xff]  ;;  %v1454_v46 = vld [vmem:[%s2170_s1 + $0x1] ss:$0 sm:$0xff]  ;;  %s1783_s1 = smov 8   ;;  %s1784_s8 = smov 16  }
  0x17   :  { %1532 = vmatprep.subr.bf16.mxu0 %v1777_v0  ;;  %s1785_s29 = smov 24   ;;  %vm1089_vm5 = vcmask 195584   ;;  %vm1323_vm6 = vcmask 523264   ;;  %s1786_s26 = smov [#allocation5]  }
  0x18   :  { %s1421_s27 = sshll.u32 %s1786_s26, 4  ;;  %s1422_s27 = int_to_ptr.vmem [resolvable:$true] %s1421_s27 }
  0x19   :  { %s1748_s28 = scalar_lea.vmem %s1422_s27, 256  ;;  %p1753_p9 = scmp.lt.s32.totalorder %s1422_s27, %s1422_s27 }
  0x1a   :  { %1533 = vmatpush3.bf16.msra.mxu0 %v1677_v2  ;;  %p1749_p8 = scmp.ne.s32.totalorder %s1422_s27, %s1748_s28  ;;  %p1754_p10 = scmp.lt.s32.totalorder %s1748_s28, %s1748_s28 }
  0x1b   :  { %1544 = vmatprep.subr.bf16.mxu0 %v1777_v0 }
  0x1c   :  { %p1755_p11 = por %p1754_p10, %p1753_p9 }
  0x1d   :  { %1535 = vmatmul.mubr.msk.bf16.vlgmr.msra.gmra.mrb[0].mxu0 %vm89_vm1, %v65_v5 }
  0x1e   :  { %1546 = vmatprep.mubr.msk.bf16.mxu0 %vm1778_vm0, %v1777_v0  ;;  %p1756_p12 = pnand %p1755_p11, %p1749_p8 }
  0xf0   :  { %v127_v7 = vpop.f32.mrb[0].mxu0 }
  0xf1   :  { %v128_v8 = vadd.f32 %v1433_v6, %v127_v7  ;;  %v1536_v9 = vpop.f32.mrb[1].mxu0 }
  0xf2   :  { %v130_v10 = vpop.f32.mrb[2].mxu0 }
  0xf3   :  { %v1482_v11 = vpack.c.bf16 %v128_v8, %v128_v8  ;;  %v131_v12 = vadd.f32 %v1433_v6, %v130_v10  ;;  %v1537_v13 = vpop.f32.mrb[3].mxu0 }
  0xf5   :  { %144 = vrot.lane.b32.xlu1 %v1482_v11, %s1779_s0  ;;  %140 = vrot.lane.b32.xlu0 %v1482_v11, %s1780_s19  ;;  %v1909_v14 = vpack.c.bf16 %v131_v12, %v131_v12 }
  0xf9   :  { %146 = vrot.lane.b32.xlu1 %v1909_v14, %s1779_s0  ;;  %142 = vrot.lane.b32.xlu0 %v1909_v14, %s1780_s19 }
  0xfd   :  { %150 = vrot.lane.b32.xlu1 %v1909_v14, %s1781_s20  ;;  %148 = vrot.lane.b32.xlu0 %v1482_v11, %s1781_s20 }
 0x101   :  { %201 = vrot.lane.b32.xlu1 %v1909_v14, %s1782_s3  ;;  %152 = vrot.lane.b32.xlu0 %v1482_v11, %s1782_s3 }
 0x167   :  { %v145_v15 = vpop.permute.xlu1 %144  ;;  %v141_v16 = vpop.permute.xlu0 %140 }
 0x168   :  { %v1915_v17 = vcombine.low %v141_v16, %v141_v16  ;;  %v1918_v20 = vcombine.low %v145_v15, %v145_v15 }
 0x16a   :  { %251 = vrot.lane.b32.xlu0 %v1915_v17, %s1782_s3 }
 0x16b   :  { %v147_v18 = vpop.permute.xlu1 %146  ;;  %v143_v19 = vpop.permute.xlu0 %142 }
 0x16c   :  { %v1920_v21 = vcombine.low %v143_v19, %v143_v19  ;;  %v1924_v24 = vcombine.low %v147_v18, %v147_v18 }
 0x16e   :  { %351 = vrot.lane.b32.xlu0 %v1918_v20, %s1782_s3  ;;  %301 = vrot.lane.b32.xlu1 %v1920_v21, %s1782_s3 }
 0x16f   :  { %v151_v22 = vpop.permute.xlu1 %150  ;;  %v149_v23 = vpop.permute.xlu0 %148 }
 0x170   :  { %v1926_v25 = vcombine.low %v149_v23, %v149_v23  ;;  %v1930_v28 = vcombine.low %v151_v22, %v151_v22 }
 0x172   :  { %401 = vrot.lane.b32.xlu1 %v1924_v24, %s1782_s3  ;;  %451 = vrot.lane.b32.xlu0 %v1926_v25, %s1782_s3 }
 0x173   :  { %v202_v26 = vpop.permute.xlu1 %201  ;;  %v153_v27 = vpop.permute.xlu0 %152 }
 0x174   :  { %v207_v29 = vsel %vm154_vm2, %v202_v26, 0  ;;  %v159_v30 = vsel %vm154_vm2, %v153_v27, 0 }
 0x175   :  { %1539 = vmatpush3.bf16.xpose.msra.mxu1 %v159_v30  ;;  %1545 = vmatpush3.bf16.xpose.msra.mxu0 %v207_v29 }
 0x176   :  { %501 = vrot.lane.b32.xlu1 %v1930_v28, %s1782_s3  ;;  %1550 = vmatprep.subr.bf16.mxu1 %v1777_v0 }
 0x177   :  { %1556 = vmatprep.subr.bf16.mxu0 %v1777_v0 }
 0x17a   :  { %667 = vrot.lane.b32.xlu1 %v1482_v11, %s1775_s23 }
 0x17c   :  { %1541 = vmatmul.mubr.msk.bf16.vlgmr.msra.gmra.mrb[0].mxu1 %vm154_vm2, %v1482_v11  ;;  %1547 = vmatmul.mubr.msk.bf16.vlgmr.msra.gmra.mrb[4].mxu0 %vm154_vm2, %v1909_v14 }
 0x17d   :  { %1552 = vmatprep.mubr.msk.bf16.mxu1 %vm1778_vm0, %v1777_v0  ;;  %1558 = vmatprep.mubr.msk.bf16.mxu0 %vm1778_vm0, %v1777_v0 }
 0x1dc   :  { %v252_v31 = vpop.permute.xlu0 %251 }
 0x1dd   :  { %v257_v32 = vsel %vm154_vm2, %v252_v31, 0 }
 0x1de   :  { %1551 = vmatpush3.bf16.xpose.msra.mxu1 %v257_v32 }
 0x1df   :  { %1562 = vmatprep.subr.bf16.mxu1 %v1777_v0 }
 0x1e0   :  { %v302_v33 = vpop.permute.xlu1 %301  ;;  %v352_v35 = vpop.permute.xlu0 %351 }
 0x1e1   :  { %v307_v34 = vsel %vm154_vm2, %v302_v33, 0  ;;  %v357_v36 = vsel %vm154_vm2, %v352_v35, 0 }
 0x1e2   :  { %1557 = vmatpush3.bf16.xpose.msra.mxu0 %v307_v34 }
 0x1e3   :  { %1568 = vmatprep.subr.bf16.mxu0 %v1777_v0 }
 0x1e4   :  { %v402_v37 = vpop.permute.xlu1 %401  ;;  %v452_v39 = vpop.permute.xlu0 %451 }
 0x1e5   :  { %1553 = vmatmul.mubr.msk.bf16.vlgmr.msra.gmra.mrb[4].mxu1 %vm154_vm2, %v141_v16  ;;  %v407_v38 = vsel %vm154_vm2, %v402_v37, 0  ;;  %v457_v41 = vsel %vm154_vm2, %v452_v39, 0 }
 0x1e6   :  { %1563 = vmatpush3.bf16.xpose.msra.mxu1 %v357_v36  ;;  %1564 = vmatprep.mubr.msk.bf16.mxu1 %vm1778_vm0, %v1777_v0 }
 0x1e7   :  { %1574 = vmatprep.subr.bf16.mxu1 %v1777_v0 }
 0x1e8   :  { %v502_v40 = vpop.permute.xlu1 %501 }
 0x1e9   :  { %1559 = vmatmul.mubr.msk.bf16.vlgmr.msra.gmra.mrb[8].mxu0 %vm154_vm2, %v143_v19  ;;  %v507_v42 = vsel %vm154_vm2, %v502_v40, 0 }
 0x1ea   :  { %1569 = vmatpush3.bf16.xpose.msra.mxu0 %v407_v38  ;;  %1570 = vmatprep.mubr.msk.bf16.mxu0 %vm1778_vm0, %v1777_v0 }
 0x1eb   :  { %1580 = vmatprep.subr.bf16.mxu0 %v1777_v0 }
 0x1ec   :  { %v668_v43 = vpop.permute.xlu1 %667 }
 0x1ed   :  { %1565 = vmatmul.mubr.msk.bf16.vlgmr.msra.gmra.mrb[8].mxu1 %vm154_vm2, %v145_v15  ;;  %v674_v44 = vsel %vm672_vm3, %v668_v43, 0 }
 0x1ee   :  { %1575 = vmatpush3.bf16.xpose.msra.mxu1 %v457_v41  ;;  %1576 = vmatprep.mubr.msk.bf16.mxu1 %vm1778_vm0, %v1777_v0 }
 0x1ef   :  { %1586 = vmatprep.subr.bf16.mxu1 %v1777_v0 }
 0x1f1   :  { %1571 = vmatmul.mubr.msk.bf16.vlgmr.msra.gmra.mrb[12].mxu0 %vm154_vm2, %v147_v18 }
 0x1f2   :  { %1581 = vmatpush3.bf16.xpose.msra.mxu0 %v507_v42  ;;  %1582 = vmatprep.mubr.msk.bf16.mxu0 %vm1778_vm0, %v1777_v0 }
 0x1f3   :  { %1592 = vmatprep.subr.bf16.mxu0 %v1777_v0 }
 0x1f5   :  { %1577 = vmatmul.mubr.msk.bf16.vlgmr.msra.gmra.mrb[12].mxu1 %vm154_vm2, %v149_v23 }
 0x1f6   :  { %1587 = vmatpush3.bf16.msra.mxu1 %v674_v44  ;;  %1588 = vmatprep.mubr.msk.bf16.mxu1 %vm1778_vm0, %v1777_v0 }
 0x1f7   :  { %1598 = vmatprep.subr.bf16.mxu1 %v1777_v0 }
 0x1f9   :  { %1583 = vmatmul.mubr.msk.bf16.vlgmr.msra.gmra.mrb[16].mxu0 %vm154_vm2, %v151_v22 }
 0x1fa   :  { %1594 = vmatprep.mubr.msk.bf16.mxu0 %vm1778_vm0, %v1777_v0 }
 0x24f   :  { %v195_v47 = vpop.f32.mrb[0].mxu1  ;;  %v243_v48 = vpop.f32.mrb[4].mxu0 }
 0x250   :  { %v563_v49 = vadd.f32 %v1453_v45, %v195_v47  ;;  %v564_v50 = vadd.f32 %v1454_v46, %v243_v48  ;;  %v1542_v51 = vpop.f32.mrb[1].mxu1  ;;  %v1548_v52 = vpop.f32.mrb[5].mxu0 }
 0x251   :  { %v198_v53 = vpop.f32.mrb[2].mxu1  ;;  %v246_v54 = vpop.f32.mrb[6].mxu0 }
 0x252   :  { %v1543_v55 = vpop.f32.mrb[3].mxu1  ;;  %v1549_v56 = vpop.f32.mrb[7].mxu0  ;;  %v571_v57 = vsel %vm154_vm2, %v563_v49, -inf  ;;  %v574_v58 = vsel %vm154_vm2, %v564_v50, -inf }
 0x253   :  { %572 = vmax.xlane.f32.xlu0 %v571_v57  ;;  %575 = vmax.xlane.f32.xlu1 %v574_v58 }
 0x2b8   :  { %v293_v59 = vpop.f32.mrb[4].mxu1 }
 0x2b9   :  { %v565_v60 = vadd.f32 %v1453_v45, %v293_v59  ;;  %v1554_v61 = vpop.f32.mrb[5].mxu1 }
 0x2ba   :  { %v296_v62 = vpop.f32.mrb[6].mxu1 }
 0x2bb   :  { %v1555_v63 = vpop.f32.mrb[7].mxu1  ;;  %v577_v1 = vsel %vm154_vm2, %v565_v60, -inf }
 0x2bc   :  { %578 = vmax.xlane.f32.xlu0 %v577_v1  ;;  %v343_v2 = vpop.f32.mrb[8].mxu0 }
 0x2bd   :  { %v566_v5 = vadd.f32 %v1454_v46, %v343_v2  ;;  %v1560_v6 = vpop.f32.mrb[9].mxu0 }
 0x2be   :  { %v346_v7 = vpop.f32.mrb[10].mxu0 }
 0x2bf   :  { %v1561_v8 = vpop.f32.mrb[11].mxu0  ;;  %v580_v9 = vsel %vm154_vm2, %v566_v5, -inf }
 0x2c0   :  { %v393_v10 = vpop.f32.mrb[8].mxu1  ;;  %581 = vmax.xlane.f32.xlu0 %v580_v9 }
 0x2c1   :  { %v1987_v11 = vadd.f32 %v1453_v45, %v393_v10  ;;  %v1566_v12 = vpop.f32.mrb[9].mxu1 }
 0x2c2   :  { %v396_v13 = vpop.f32.mrb[10].mxu1 }
 0x2c3   :  { %v1567_v15 = vpop.f32.mrb[11].mxu1  ;;  %v583_v16 = vsel %vm154_vm2, %v1987_v11, -inf }
 0x2c4   :  { %584 = vmax.xlane.f32.xlu1 %v583_v16  ;;  %v443_v18 = vpop.f32.mrb[12].mxu0 }
 0x2c5   :  { %v1991_v19 = vadd.f32 %v1454_v46, %v443_v18  ;;  %v1572_v22 = vpop.f32.mrb[13].mxu0 }
 0x2c6   :  { %v446_v23 = vpop.f32.mrb[14].mxu0 }
 0x2c7   :  { %v1573_v26 = vpop.f32.mrb[15].mxu0  ;;  %v586_v27 = vsel %vm154_vm2, %v1991_v19, -inf }
 0x2c8   :  { %v493_v29 = vpop.f32.mrb[12].mxu1  ;;  %587 = vmax.xlane.f32.xlu0 %v586_v27 }
 0x2c9   :  { %v569_v30 = vadd.f32 %v1453_v45, %v493_v29  ;;  %v1578_v31 = vpop.f32.mrb[13].mxu1 }
 0x2ca   :  { %v496_v32 = vpop.f32.mrb[14].mxu1 }
 0x2cb   :  { %v1579_v33 = vpop.f32.mrb[15].mxu1  ;;  %v589_v34 = vsel %vm154_vm2, %v569_v30, -inf }
 0x2cc   :  { %590 = vmax.xlane.f32.xlu1 %v589_v34  ;;  %v543_v35 = vpop.f32.mrb[16].mxu0 }
 0x2cd   :  { %v570_v36 = vadd.f32 %v1454_v46, %v543_v35  ;;  %v1584_v37 = vpop.f32.mrb[17].mxu0 }
 0x2ce   :  { %v546_v38 = vpop.f32.mrb[18].mxu0 }
 0x2cf   :  { %v1585_v39 = vpop.f32.mrb[19].mxu0  ;;  %v592_v40 = vsel %vm154_vm2, %v570_v36, -inf }
 0x2d0   :  { %593 = vmax.xlane.f32.xlu0 %v592_v40 }
 0x2dd   :  { %764 = vrot.lane.b32.xlu1 %v1915_v17, %s1775_s23 }
 0x2e0   :  { %v573_v41 = vpop.xlane.xlu0 %572  ;;  %v576_v42 = vpop.xlane.xlu1 %575 }
 0x2e1   :  { %812 = vrot.lane.b32.xlu1 %v1920_v21, %s1775_s23  ;;  %v595_v43 = vsub.f32 %v563_v49, %v573_v41  ;;  %v596_v44 = vsub.f32 %v564_v50, %v576_v42 }
 0x2e3   :  { %v603_v45 = vmul.f32 1.442695, %v595_v43  ;;  %v605_v46 = vmul.f32 1.442695, %v596_v44 }
 0x2e5   :  { %1686 = vpow2.f32 %v603_v45 }
 0x2e6   :  { %716 = vrot.lane.b32.xlu0 %v1909_v14, %s1775_s23  ;;  %1688 = vpow2.f32 %v605_v46 }
 0x2ef   :  { %v1687_v47 = vpop.eup %1686 }
 0x2f0   :  { %v1689_v48 = vpop.eup %1688  ;;  %v619_v51 = vsel %vm154_vm2, %v1687_v47, 0.0 }
 0x2f1   :  { %v622_v17 = vsel %vm154_vm2, %v1689_v48, 0.0 }
 0x305   :  { %620 = vadd.xlane.f32.xlu1 %v619_v51  ;;  %623 = vadd.xlane.f32.xlu0 %v622_v17 }
 0x349   :  { %v579_v21 = vpop.xlane.xlu0 %578 }
 0x34a   :  { %v597_v52 = vsub.f32 %v565_v60, %v579_v21 }
 0x34c   :  { %v607_v53 = vmul.f32 1.442695, %v597_v52 }
 0x34d   :  { %v582_v14 = vpop.xlane.xlu0 %581 }
 0x34e   :  { %1690 = vpow2.f32 %v607_v53  ;;  %v598_v54 = vsub.f32 %v566_v5, %v582_v14 }
 0x350   :  { %v609_v49 = vmul.f32 1.442695, %v598_v54 }
 0x351   :  { %v585_v62 = vpop.xlane.xlu1 %584 }
 0x352   :  { %1692 = vpow2.f32 %v609_v49  ;;  %v599_v63 = vsub.f32 %v1987_v11, %v585_v62 }
 0x354   :  { %v611_v5 = vmul.f32 1.442695, %v599_v63 }
 0x355   :  { %v588_v55 = vpop.xlane.xlu0 %587 }
 0x356   :  { %v600_v2 = vsub.f32 %v1991_v19, %v588_v55  ;;  %1694 = vpow2.f32 %v611_v5 }
 0x358   :  { %v2005_v50 = vpop.eup %1690  ;;  %v613_v7 = vmul.f32 1.442695, %v600_v2 }
 0x359   :  { %v625_v56 = vsel %vm154_vm2, %v2005_v50, 0.0  ;;  %v591_v1 = vpop.xlane.xlu1 %590 }
 0x35a   :  { %626 = vadd.xlane.f32.xlu1 %v625_v56  ;;  %v601_v6 = vsub.f32 %v569_v30, %v591_v1  ;;  %1696 = vpow2.f32 %v613_v7 }
 0x35c   :  { %v2009_v57 = vpop.eup %1692  ;;  %v615_v8 = vmul.f32 1.442695, %v601_v6 }
 0x35d   :  { %v594_v58 = vpop.xlane.xlu0 %593  ;;  %v628_v59 = vsel %vm154_vm2, %v2009_v57, 0.0  ;;  %v765_v12 = vpop.permute.xlu1 %764 }
 0x35e   :  { %629 = vadd.xlane.f32.xlu0 %v628_v59  ;;  %v602_v9 = vsub.f32 %v570_v36, %v594_v58  ;;  %1698 = vpow2.f32 %v615_v8  ;;  %v770_v34 = vsel %vm672_vm3, %v765_v12, 0 }
 0x360   :  { %v617_v10 = vmul.f32 1.442695, %v602_v9 }
 0x361   :  { %v717_v60 = vpop.permute.xlu0 %716  ;;  %v813_v13 = vpop.permute.xlu1 %812 }
 0x362   :  { %v722_v61 = vsel %vm672_vm3, %v717_v60, 0  ;;  %1700 = vpow2.f32 %v617_v10  ;;  %v818_v35 = vsel %vm672_vm3, %v813_v13, 0 }
 0x363   :  { %1593 = vmatpush3.bf16.msra.mxu0 %v722_v61 }
 0x364   :  { %1604 = vmatprep.subr.bf16.mxu0 %v1777_v0 }
 0x36b   :  { %908 = vrot.lane.b32.xlu1 %v1924_v24, %s1775_s23  ;;  %v2021_v24 = vpop.eup %1694 }
 0x36c   :  { %v631_v11 = vsel %vm154_vm2, %v2021_v24, 0.0 }
 0x374   :  { %860 = vrot.lane.b32.xlu0 %v1918_v20, %s1775_s23  ;;  %v2023_v20 = vpop.eup %1696 }
 0x375   :  { %v2027_v15 = vpop.eup %1698  ;;  %v634_v22 = vsel %vm154_vm2, %v2023_v20, 0.0 }
 0x376   :  { %v637_v19 = vsel %vm154_vm2, %v2027_v15, 0.0  ;;  %v2033_v23 = vpop.eup %1700 }
 0x377   :  { %v640_v26 = vsel %vm154_vm2, %v2033_v23, 0.0 }
 0x38f   :  { %632 = vadd.xlane.f32.xlu1 %v631_v11 }
 0x392   :  { %v621_v16 = vpop.xlane.xlu1 %620  ;;  %v624_v18 = vpop.xlane.xlu0 %623 }
 0x393   :  { %1702 = vrcp.f32 %v621_v16  ;;  %638 = vadd.xlane.f32.xlu1 %v637_v19  ;;  %635 = vadd.xlane.f32.xlu0 %v634_v22  ;;  %v1678_v22 = vld [vmem:[%s2173_s4] sm:$0xff]  }
 0x394   :  { %1704 = vrcp.f32 %v624_v18 }
 0x397   :  { %641 = vadd.xlane.f32.xlu0 %v640_v26 }
 0x39d   :  { %v1703_v27 = vpop.eup %1702 }
 0x39e   :  { %v1705_v29 = vpop.eup %1704  ;;  %v651_v30 = vmul.f32 %v1703_v27, %v1687_v47 }
 0x39f   :  { %v652_v31 = vmul.f32 %v1705_v29, %v1689_v48 }
 0x3a0   :  { %v659_v32 = vpack.c.bf16 %v651_v30, %v651_v30  ;;  %v1679_v30 = vld [vmem:[%s2173_s4 + $0x8] sm:$0xff]  }
 0x3a1   :  { %v660_v33 = vpack.c.bf16 %v652_v31, %v652_v31 }
 0x3a2   :  { %1589 = vmatmul.mubr.msk.bf16.vlgmr.msra.gmra.mrb[16].mxu1 %vm154_vm2, %v659_v32 }
 0x3a3   :  { %1595 = vmatmul.mubr.msk.bf16.vlgmr.msra.gmra.mrb[20].mxu0 %vm154_vm2, %v660_v33  ;;  %1599 = vmatpush3.bf16.msra.mxu1 %v770_v34 }
 0x3a4   :  { %1605 = vmatpush3.bf16.msra.mxu0 %v818_v35  ;;  %1004 = vrot.lane.b32.xlu1 %v1930_v28, %s1775_s23 }
 0x3a5   :  { %1600 = vmatprep.mubr.msk.bf16.mxu1 %vm1778_vm0, %v1777_v0  ;;  %1610 = vmatprep.subr.bf16.mxu1 %v1777_v0 }
 0x3a6   :  { %1606 = vmatprep.mubr.msk.bf16.mxu0 %vm1778_vm0, %v1777_v0  ;;  %1616 = vmatprep.subr.bf16.mxu0 %v1777_v0 }
 0x3ad   :  { %956 = vrot.lane.b32.xlu0 %v1926_v25, %s1775_s23 }
 0x3e7   :  { %v627_v36 = vpop.xlane.xlu1 %626 }
 0x3e8   :  { %1706 = vrcp.f32 %v627_v36 }
 0x3eb   :  { %v630_v37 = vpop.xlane.xlu0 %629  ;;  %v909_v44 = vpop.permute.xlu1 %908 }
 0x3ec   :  { %1708 = vrcp.f32 %v630_v37  ;;  %v914_v45 = vsel %vm672_vm3, %v909_v44, 0 }
 0x3ef   :  { %v861_v39 = vpop.permute.xlu0 %860 }
 0x3f0   :  { %v866_v43 = vsel %vm672_vm3, %v861_v39, 0 }
 0x3f2   :  { %v1707_v38 = vpop.eup %1706 }
 0x3f3   :  { %v653_v28 = vmul.f32 %v1707_v38, %v2005_v50 }
 0x3f5   :  { %v661_v40 = vpack.c.bf16 %v653_v28, %v653_v28 }
 0x3f6   :  { %v1709_v41 = vpop.eup %1708 }
 0x3f7   :  { %v654_v42 = vmul.f32 %v1709_v41, %v2009_v57  ;;  %1601 = vmatmul.mubr.msk.bf16.vlgmr.msra.gmra.mrb[20].mxu1 %vm154_vm2, %v661_v40 }
 0x3f8   :  { %1611 = vmatpush3.bf16.msra.mxu1 %v866_v43  ;;  %1612 = vmatprep.mubr.msk.bf16.mxu1 %vm1778_vm0, %v1777_v0 }
 0x3f9   :  { %v662_v25 = vpack.c.bf16 %v654_v42, %v654_v42  ;;  %1622 = vmatprep.subr.bf16.mxu1 %v1777_v0 }
 0x3fb   :  { %1607 = vmatmul.mubr.msk.bf16.vlgmr.msra.gmra.mrb[24].mxu0 %vm154_vm2, %v662_v25 }
 0x3fc   :  { %1617 = vmatpush3.bf16.msra.mxu0 %v914_v45  ;;  %1618 = vmatprep.mubr.msk.bf16.mxu0 %vm1778_vm0, %v1777_v0 }
 0x3fd   :  { %1628 = vmatprep.subr.bf16.mxu0 %v1777_v0 }
 0x41c   :  { %v633_v46 = vpop.xlane.xlu1 %632 }
 0x41d   :  { %1710 = vrcp.f32 %v633_v46 }
 0x420   :  { %v639_v47 = vpop.xlane.xlu1 %638  ;;  %v636_v48 = vpop.xlane.xlu0 %635 }
 0x421   :  { %1712 = vrcp.f32 %v639_v47 }
 0x422   :  { %1714 = vrcp.f32 %v636_v48 }
 0x424   :  { %v642_v51 = vpop.xlane.xlu0 %641  ;;  %v1005_v56 = vpop.permute.xlu1 %1004 }
 0x425   :  { %1716 = vrcp.f32 %v642_v51  ;;  %v1010_v59 = vsel %vm672_vm3, %v1005_v56, 0 }
 0x427   :  { %v1711_v17 = vpop.eup %1710 }
 0x428   :  { %v655_v21 = vmul.f32 %v1711_v17, %v2021_v24  ;;  %v957_v52 = vpop.permute.xlu0 %956 }
 0x429   :  { %v962_v49 = vsel %vm672_vm3, %v957_v52, 0 }
 0x42a   :  { %v663_v53 = vpack.c.bf16 %v655_v21, %v655_v21 }
 0x42b   :  { %v1713_v14 = vpop.eup %1712 }
 0x42c   :  { %v1715_v54 = vpop.eup %1714  ;;  %1613 = vmatmul.mubr.msk.bf16.vlgmr.msra.gmra.mrb[24].mxu1 %vm154_vm2, %v663_v53  ;;  %v657_v55 = vmul.f32 %v1713_v14, %v2027_v15 }
 0x42d   :  { %v656_v50 = vmul.f32 %v1715_v54, %v2023_v20  ;;  %1623 = vmatpush3.bf16.msra.mxu1 %v962_v49  ;;  %1624 = vmatprep.mubr.msk.bf16.mxu1 %vm1778_vm0, %v1777_v0 }
 0x42e   :  { %1634 = vmatprep.subr.bf16.mxu1 %v1777_v0  ;;  %v665_v60 = vpack.c.bf16 %v657_v55, %v657_v55 }
 0x42f   :  { %v664_v57 = vpack.c.bf16 %v656_v50, %v656_v50  ;;  %v1717_v58 = vpop.eup %1716 }
 0x430   :  { %v658_v61 = vmul.f32 %v1717_v58, %v2033_v23 }
 0x431   :  { %1619 = vmatmul.mubr.msk.bf16.vlgmr.msra.gmra.mrb[28].mxu0 %vm154_vm2, %v664_v57  ;;  %v1463_v57 = vld [vmem:[%s2174_s5] ss:$0 sm:$0xff] }
 0x432   :  { %1629 = vmatpush3.bf16.msra.mxu0 %v1010_v59  ;;  %1630 = vmatprep.mubr.msk.bf16.mxu0 %vm1778_vm0, %v1777_v0  ;;  %v666_v62 = vpack.c.bf16 %v658_v61, %v658_v61 }
 0x433   :  { %1642 = vmatprep.subr.bf16.mxu0 %v1777_v0 }
 0x434   :  { %1625 = vmatmul.mubr.msk.bf16.vlgmr.msra.gmra.mrb[28].mxu1 %vm154_vm2, %v665_v60 }
 0x435   :  { %1638 = vmatprep.mubr.msk.bf16.mxu1 %vm1778_vm0, %v1777_v0  ;;  %1635 = vmatpush3.bf16.msra.mxu1 %v1678_v22 }
 0x436   :  { %1636 = vmatprep.subr.bf16.mxu1 %v1777_v0 }
 0x439   :  { %1631 = vmatmul.mubr.msk.bf16.vlgmr.msra.gmra.mrb[32].mxu0 %vm154_vm2, %v666_v62  ;;  %1637 = vmatpush3.bf16.msra.mxu1 %v1679_v30 }
 0x43a   :  { %1646 = vmatprep.mubr.msk.bf16.mxu0 %vm1778_vm0, %v1777_v0  ;;  %1650 = vmatprep.subr.bf16.mxu1 %v1777_v0 }
 0x475   :  { %v2083_v63 = vpop.f32.mrb[16].mxu1 }
 0x476   :  { %v2085_v1 = vpop.f32.mrb[20].mxu0  ;;  %v1590_v2 = vpop.f32.mrb[17].mxu1  ;;  %v1052_v51 = vpack.c.bf16 %v2083_v63, %v2083_v63 }
 0x477   :  { %v1596_v5 = vpop.f32.mrb[21].mxu0  ;;  %v713_v6 = vpop.f32.mrb[18].mxu1  ;;  %v1053_v17 = vpack.c.bf16 %v2085_v1, %v2085_v1 }
 0x478   :  { %v761_v7 = vpop.f32.mrb[22].mxu0  ;;  %v1591_v8 = vpop.f32.mrb[19].mxu1 }
 0x479   :  { %v1597_v9 = vpop.f32.mrb[23].mxu0 }
 0x4ca   :  { %v806_v10 = vpop.f32.mrb[20].mxu1 }
 0x4cb   :  { %v1054_v12 = vpack.c.bf16 %v806_v10, %v806_v10  ;;  %v1602_v24 = vpop.f32.mrb[21].mxu1 }
 0x4cc   :  { %v809_v20 = vpop.f32.mrb[22].mxu1 }
 0x4cd   :  { %v1603_v13 = vpop.f32.mrb[23].mxu1  ;;  %1062 = vrot.lane.b32.xlu0 %v1054_v12, %s1783_s1 }
 0x4ce   :  { %v854_v11 = vpop.f32.mrb[24].mxu0 }
 0x4cf   :  { %v1055_v15 = vpack.c.bf16 %v854_v11, %v854_v11  ;;  %v1608_v16 = vpop.f32.mrb[25].mxu0 }
 0x4d0   :  { %v857_v18 = vpop.f32.mrb[26].mxu0  ;;  %v1682_v16 = vld [vmem:[%s2179_s10] sm:$0xff]  }
 0x4d1   :  { %1064 = vrot.lane.b32.xlu1 %v1055_v15, %s1783_s1  ;;  %v1609_v19 = vpop.f32.mrb[27].mxu0  ;;  %v1680_v15 = vld [vmem:[#allocation2] sm:$0xff]   ;;  %v1683_v18 = vld [vmem:[%s2179_s10 + $0x8] sm:$0xff]  }
 0x4d2   :  { %1643 = vmatpush3.bf16.msra.mxu0 %v1680_v15  ;;  %v1481_v15 = vld [vmem:[%s2182_s13] ss:$0 sm:$0xff] }
 0x4d3   :  { %1644 = vmatprep.subr.bf16.mxu0 %v1777_v0 }
 0x4ff   :  { %v902_v23 = vpop.f32.mrb[24].mxu1 }
 0x500   :  { %v1056_v26 = vpack.c.bf16 %v902_v23, %v902_v23  ;;  %v1614_v27 = vpop.f32.mrb[25].mxu1 }
 0x501   :  { %v905_v29 = vpop.f32.mrb[26].mxu1 }
 0x502   :  { %1068 = vrot.lane.b32.xlu0 %v1056_v26, %s1784_s8  ;;  %v1615_v31 = vpop.f32.mrb[27].mxu1 }
 0x504   :  { %v950_v32 = vpop.f32.mrb[28].mxu0 }
 0x505   :  { %v1057_v33 = vpack.c.bf16 %v950_v32, %v950_v32  ;;  %v1620_v34 = vpop.f32.mrb[29].mxu0  ;;  %v1468_v32 = vld [vmem:[%s2175_s6] ss:$0 sm:$0xff] }
 0x506   :  { %v953_v35 = vpop.f32.mrb[30].mxu0 }
 0x507   :  { %1070 = vrot.lane.b32.xlu1 %v1057_v33, %s1784_s8  ;;  %v1621_v36 = vpop.f32.mrb[31].mxu0  ;;  %v998_v37 = vpop.f32.mrb[28].mxu1 }
 0x508   :  { %v1058_v38 = vpack.c.bf16 %v998_v37, %v998_v37  ;;  %v1626_v28 = vpop.f32.mrb[29].mxu1  ;;  %v1469_v36 = vld [vmem:[%s2176_s7] ss:$0 sm:$0xff] }
 0x509   :  { %v1001_v39 = vpop.f32.mrb[30].mxu1 }
 0x50a   :  { %1074 = vrot.lane.b32.xlu0 %v1058_v38, %s1785_s29  ;;  %v1627_v40 = vpop.f32.mrb[31].mxu1 }
 0x50b   :  { %v1684_v40 = vld [vmem:[%s2179_s10 + $0x10] sm:$0xff]  }
 0x50c   :  { %v1046_v41 = vpop.f32.mrb[32].mxu0 }
 0x50d   :  { %v1059_v42 = vpack.c.bf16 %v1046_v41, %v1046_v41  ;;  %v1632_v43 = vpop.f32.mrb[33].mxu0  ;;  %v1685_v41 = vld [vmem:[%s2179_s10 + $0x18] sm:$0xff]  }
 0x50e   :  { %v1049_v44 = vpop.f32.mrb[34].mxu0 }
 0x50f   :  { %1076 = vrot.lane.b32.xlu1 %v1059_v42, %s1785_s29  ;;  %v1633_v25 = vpop.f32.mrb[35].mxu0  ;;  %v1470_v42 = vld [vmem:[%s2178_s9] ss:$0 sm:$0xff] }
 0x53f   :  { %v1063_v45 = vpop.permute.xlu0 %1062 }
 0x540   :  { %v1080_v52 = vsel %vm154_vm2, %v1052_v51, %v1063_v45 }
 0x543   :  { %v1065_v46 = vpop.permute.xlu1 %1064 }
 0x544   :  { %v1083_v53 = vsel %vm154_vm2, %v1053_v17, %v1065_v46 }
 0x574   :  { %v1069_v47 = vpop.permute.xlu0 %1068 }
 0x575   :  { %v1086_v14 = vsel %vm1084_vm4, %v1080_v52, %v1069_v47 }
 0x579   :  { %v1071_v48 = vpop.permute.xlu1 %1070 }
 0x57a   :  { %v1088_v54 = vsel %vm1084_vm4, %v1083_v53, %v1071_v48 }
 0x57c   :  { %v1075_v21 = vpop.permute.xlu0 %1074 }
 0x57d   :  { %v1091_v50 = vsel %vm1089_vm5, %v1086_v14, %v1075_v21 }
 0x581   :  { %v1077_v49 = vpop.permute.xlu1 %1076 }
 0x582   :  { %v1093_v55 = vsel %vm1089_vm5, %v1088_v54, %v1077_v49 }
 0x583   :  { %v1464_v56 = vcombine.low %v1091_v50, %v1093_v55 }
 0x585   :  { %1639 = vmatmul.mubr.msk.bf16.vlgmr.msra.gmra.mrb[32].mxu1 %vm89_vm1, %v1464_v56 }
 0x586   :  { %1658 = vmatprep.mubr.msk.bf16.mxu1 %vm1778_vm0, %v1777_v0  ;;  %1651 = vmatpush3.bf16.msra.mxu1 %v1682_v16 }
 0x587   :  { %1652 = vmatprep.subr.bf16.mxu1 %v1777_v0 }
 0x58a   :  { %1653 = vmatpush3.bf16.msra.mxu1 %v1683_v18 }
 0x58b   :  { %1654 = vmatprep.subr.bf16.mxu1 %v1777_v0 }
 0x58e   :  { %1655 = vmatpush3.bf16.msra.mxu1 %v1684_v40 }
 0x58f   :  { %1656 = vmatprep.subr.bf16.mxu1 %v1777_v0  ;;  %v1474_v0 = vld [vmem:[%s2180_s11] ss:$0 sm:$0xff] }
 0x592   :  { %1657 = vmatpush3.bf16.msra.mxu1 %v1685_v41 }
 0x658   :  { %v1159_v58 = vpop.f32.mrb[32].mxu1 }
 0x659   :  { %v1160_v59 = vadd.f32 %v1463_v57, %v1159_v58  ;;  %v1640_v60 = vpop.f32.mrb[33].mxu1 }
 0x65a   :  { %v1162_v61 = vpop.f32.mrb[34].mxu1 }
 0x65b   :  { %v1163_v62 = vadd.f32 %v1463_v57, %v1162_v61  ;;  %v1641_v63 = vpop.f32.mrb[35].mxu1  ;;  %v1166_v1 = vadd.f32 %v1160_v59, %v1892_v3 }
 0x65d   :  { %v1170_v2 = vsel %vm89_vm1, %v1166_v1, 0.0  ;;  %v1167_v5 = vadd.f32 %v1163_v62, %v1897_v4  ;;  %v1681_v4 = vld [vmem:[#allocation2 + $0x8] sm:$0xff]  }
 0x65e   :  { %1171 = vadd.xlane.f32.xlu0 %v1170_v2  ;;  %1645 = vmatpush3.bf16.msra.mxu0 %v1681_v4 }
 0x65f   :  { %v1173_v6 = vsel %vm89_vm1, %v1167_v5, 0.0 }
 0x660   :  { %1174 = vadd.xlane.f32.xlu1 %v1173_v6 }
 0x6eb   :  { %v1172_v7 = vpop.xlane.xlu0 %1171 }
 0x6ec   :  { %v1177_v8 = vmul.f32 0.03125, %v1172_v7 }
 0x6ed   :  { %v1175_v9 = vpop.xlane.xlu1 %1174 }
 0x6ee   :  { %v1179_v10 = vsub.f32 %v1166_v1, %v1177_v8  ;;  %v1178_v12 = vmul.f32 0.03125, %v1175_v9 }
 0x6f0   :  { %v1180_v24 = vsub.f32 %v1167_v5, %v1178_v12  ;;  %v1181_v20 = vmul.f32 %v1179_v10, %v1179_v10 }
 0x6f2   :  { %v1183_v13 = vsel %vm89_vm1, %v1181_v20, 0.0  ;;  %v1182_v11 = vmul.f32 %v1180_v24, %v1180_v24 }
 0x6f3   :  { %1184 = vadd.xlane.f32.xlu0 %v1183_v13  ;;  %v1480_v13 = vld [vmem:[%s2181_s12] ss:$0 sm:$0xff] }
 0x6f4   :  { %v1186_v3 = vsel %vm89_vm1, %v1182_v11, 0.0 }
 0x6f7   :  { %1187 = vadd.xlane.f32.xlu0 %v1186_v3 }
 0x780   :  { %v1185_v19 = vpop.xlane.xlu0 %1184 }
 0x781   :  { %v1189_v22 = vmul.f32 0.03125, %v1185_v19 }
 0x783   :  { %v1191_v23 = vadd.f32 1e-05, %v1189_v22 }
 0x784   :  { %v1188_v26 = vpop.xlane.xlu0 %1187 }
 0x785   :  { %1718 = vrsqrt.f32 %v1191_v23  ;;  %v1190_v27 = vmul.f32 0.03125, %v1188_v26 }
 0x787   :  { %v1192_v29 = vadd.f32 1e-05, %v1190_v27 }
 0x789   :  { %1720 = vrsqrt.f32 %v1192_v29 }
 0x78f   :  { %v1719_v30 = vpop.eup %1718 }
 0x790   :  { %v1195_v31 = vmul.f32 %v1719_v30, %v1179_v10 }
 0x792   :  { %v1203_v34 = vmul.f32 %v1468_v32, %v1195_v31 }
 0x793   :  { %v1721_v33 = vpop.eup %1720 }
 0x794   :  { %v1196_v35 = vmul.f32 %v1721_v33, %v1180_v24  ;;  %v1211_v38 = vadd.f32 %v1469_v36, %v1203_v34 }
 0x796   :  { %v1204_v37 = vmul.f32 %v1468_v32, %v1196_v35 }
 0x798   :  { %v1212_v28 = vadd.f32 %v1469_v36, %v1204_v37 }
 0x79a   :  { %v1213_v39 = vpack.c.bf16 %v1212_v28, %v1211_v38 }
 0x79c   :  { %1647 = vmatmul.mubr.msk.bf16.vlgmr.msra.gmra.mrb[36].mxu0 %vm89_vm1, %v1213_v39 }
 0x86f   :  { %v1274_v43 = vpop.f32.mrb[36].mxu0 }
 0x870   :  { %v1275_v44 = vadd.f32 %v1470_v42, %v1274_v43  ;;  %v1648_v25 = vpop.f32.mrb[37].mxu0 }
 0x871   :  { %v1277_v45 = vpop.f32.mrb[38].mxu0 }
 0x872   :  { %v1278_v46 = vadd.f32 %v1470_v42, %v1277_v45  ;;  %v1649_v47 = vpop.f32.mrb[39].mxu0  ;;  %v1281_v48 = vmax.f32 %v1275_v44, 0.0 }
 0x874   :  { %v1282_v51 = vmax.f32 %v1278_v46, 0.0 }
 0x876   :  { %v1283_v17 = vpack.c.bf16 %v1282_v51, %v1281_v48 }
 0x878   :  { %1659 = vmatmul.mubr.msk.bf16.vlgmr.msra.gmra.mrb[36].mxu1 %vm1323_vm6, %v1283_v17 }
 0x94b   :  { %v1361_v21 = vpop.f32.mrb[36].mxu1 }
 0x94c   :  { %v1362_v52 = vadd.f32 %v1474_v0, %v1361_v21  ;;  %v1660_v53 = vpop.f32.mrb[37].mxu1 }
 0x94d   :  { %v1364_v14 = vpop.f32.mrb[38].mxu1 }
 0x94e   :  { %v1365_v54 = vadd.f32 %v1474_v0, %v1364_v14  ;;  %v1661_v49 = vpop.f32.mrb[39].mxu1  ;;  %v1368_v50 = vadd.f32 %v1362_v52, %v1211_v38 }
 0x950   :  { %v1372_v55 = vsel %vm89_vm1, %v1368_v50, 0.0  ;;  %v1369_v56 = vadd.f32 %v1365_v54, %v1212_v28 }
 0x951   :  { %1373 = vadd.xlane.f32.xlu1 %v1372_v55 }
 0x952   :  { %v1375_v57 = vsel %vm89_vm1, %v1369_v56, 0.0 }
 0x953   :  { %1376 = vadd.xlane.f32.xlu0 %v1375_v57 }
 0x9de   :  { %v1374_v58 = vpop.xlane.xlu1 %1373 }
 0x9df   :  { %v1378_v59 = vmul.f32 0.03125, %v1374_v58 }
 0x9e0   :  { %v1377_v60 = vpop.xlane.xlu0 %1376 }
 0x9e1   :  { %v1380_v61 = vsub.f32 %v1368_v50, %v1378_v59  ;;  %v1379_v62 = vmul.f32 0.03125, %v1377_v60 }
 0x9e3   :  { %v1381_v63 = vsub.f32 %v1369_v56, %v1379_v62  ;;  %v1382_v1 = vmul.f32 %v1380_v61, %v1380_v61 }
 0x9e5   :  { %v1384_v2 = vsel %vm89_vm1, %v1382_v1, 0.0  ;;  %v1383_v5 = vmul.f32 %v1381_v63, %v1381_v63 }
 0x9e6   :  { %1385 = vadd.xlane.f32.xlu1 %v1384_v2 }
 0x9e7   :  { %v1387_v6 = vsel %vm89_vm1, %v1383_v5, 0.0 }
 0x9e8   :  { %1388 = vadd.xlane.f32.xlu0 %v1387_v6 }
 0xa73   :  { %v1386_v7 = vpop.xlane.xlu1 %1385 }
 0xa74   :  { %v1390_v8 = vmul.f32 0.03125, %v1386_v7 }
 0xa75   :  { %v1389_v9 = vpop.xlane.xlu0 %1388 }
 0xa76   :  { %v1392_v10 = vadd.f32 1e-05, %v1390_v8  ;;  %v1391_v12 = vmul.f32 0.03125, %v1389_v9 }
 0xa78   :  { %1722 = vrsqrt.f32 %v1392_v10  ;;  %v1393_v24 = vadd.f32 1e-05, %v1391_v12 }
 0xa7a   :  { %1724 = vrsqrt.f32 %v1393_v24 }
 0xa82   :  { %v1723_v20 = vpop.eup %1722 }
 0xa83   :  { %v1396_v11 = vmul.f32 %v1723_v20, %v1380_v61 }
 0xa84   :  { %v1725_v3 = vpop.eup %1724 }
 0xa85   :  { %v1404_v4 = vmul.f32 %v1480_v13, %v1396_v11  ;;  %v1397_v16 = vmul.f32 %v1725_v3, %v1381_v63 }
 0xa87   :  { %v1405_v18 = vmul.f32 %v1480_v13, %v1397_v16  ;;  %v1412_v19 = vadd.f32 %v1481_v15, %v1404_v4 }
 0xa89   :  { %v1413_v22 = vadd.f32 %v1481_v15, %v1405_v18  ;;  %1414 = vst.msk [vmem:[#allocation5] sm:$0xff] %vm89_vm1, %v1412_v19 }
 0xa8b   :  { %1415 = vst.msk [vmem:[#allocation5 + $0x8] sm:$0xff] %vm89_vm1, %v1413_v22 }
 0xa8c   :  { %1759 = shalt.err (!%p1756_p12)
}
 0xa8d   :  { %s1760_s8 = scalar_lea.hbm %s2183_s14, 256 }
 0xa8e   :  { %p1761_p13 = scmp.ne.s32.totalorder %s2183_s14, %s1760_s8  ;;  %p1764_p0 = scmp.lt.u32.totalorder %s1760_s8, %s2183_s14 }
 0xa90   :  { %p1766_p1 = pnand %p1764_p0, %p1761_p13 }
 0xa92   :  { %1769 = shalt.err (!%p1766_p1)
}
 0xa93   :  { %s1787_s15 = smov 128  }
 0xa94   :  { %1427 = dma.vmem_to_hbm [thread:$0]  %s1422_s27, 256, %s2183_s14, [#allocation4], %s1787_s15, %s1787_s15, %s1783_s1  }
 0xa95   :  { %1772 = dma.done.wait [#allocation4], 256  }
 0xa96   :  { %1773 = vsyncadd [#allocation4], 4294967040 }
 0xa97   :  { %1431 = vsyncpa [#allocation3], 1 }
 0xa98   :  { %1432 = vsyncpa [#allocation4], 1 }

// kernel: tpu_custom_call.1
= control target key start
LH: loop header
LB: loop body
LE: loop exit
PB: predicated region body
PF: predicated region fallthrough
CT: control target
= control target key end

     0   :  { %19 = vsyncpa [#allocation3], 0  ;;  %s2169_s0 = inlined_call_operand.vmem [shape: f32[2,8,32], index: 0, kind: input, shape index: {}]   ;;  %s2170_s1 = inlined_call_operand.vmem [shape: f32[2,1,8], index: 1, kind: input, shape index: {}]   ;;  %s2171_s2 = inlined_call_operand.vmem [shape: bf16[32,96], index: 2, kind: input, shape index: {}]   ;;  %s2172_s3 = inlined_call_operand.vmem [shape: f32[1,96], index: 3, kind: input, shape index: {}]   ;;  %s2173_s4 = inlined_call_operand.vmem [shape: bf16[32,32], index: 4, kind: input, shape index: {}]   ;;  %s2174_s5 = inlined_call_operand.vmem [shape: f32[1,32], index: 5, kind: input, shape index: {}]   ;;  %s2175_s6 = inlined_call_operand.vmem [shape: f32[1,32], index: 6, kind: input, shape index: {}]   ;;  %s2176_s7 = inlined_call_operand.vmem [shape: f32[1,32], index: 7, kind: input, shape index: {}]   ;;  %s2177_s8 = inlined_call_operand.hbm [shape: bf16[32,64], index: 8, kind: input, shape index: {}]   ;;  %s2178_s9 = inlined_call_operand.vmem [shape: f32[1,64], index: 9, kind: input, shape index: {}]   ;;  %s2179_s10 = inlined_call_operand.vmem [shape: bf16[64,32], index: 10, kind: input, shape index: {}]   ;;  %s2180_s11 = inlined_call_operand.vmem [shape: f32[1,32], index: 11, kind: input, shape index: {}]   ;;  %s2181_s12 = inlined_call_operand.vmem [shape: f32[1,32], index: 12, kind: input, shape index: {}]   ;;  %s2182_s13 = inlined_call_operand.vmem [shape: f32[1,32], index: 13, kind: input, shape index: {}]   ;;  %s2183_s14 = inlined_call_operand.hbm [shape: f32[2,8,32], index: 14, kind: output, shape index: {}]  }
   0x1   :  { %20 = vsyncpa [#allocation4], 0  ;;  %s1774_s29 = smov [#allocation2]   ;;  %s1726_s17 = scalar_lea.hbm %s2177_s8, 256 }
   0x2   :  { %s42_s30 = sshll.u32 %s1774_s29, 4  ;;  %p1727_p0 = scmp.ne.s32.totalorder %s2177_s8, %s1726_s17  ;;  %s43_s30 = int_to_ptr.vmem [resolvable:$true] %s42_s30 }
   0x3   :  { %p1730_p1 = scmp.lt.u32.totalorder %s1726_s17, %s2177_s8 }
   0x5   :  { %p1732_p2 = pnand %p1730_p1, %p1727_p0 }
   0x7   :  { %1735 = shalt.err (!%p1732_p2)
}
   0x8   :  { %s1736_s22 = scalar_lea.vmem %s43_s30, 256  ;;  %p1741_p4 = scmp.lt.s32.totalorder %s43_s30, %s43_s30 }
   0x9   :  { %p1737_p3 = scmp.ne.s32.totalorder %s43_s30, %s1736_s22  ;;  %p1742_p5 = scmp.lt.s32.totalorder %s1736_s22, %s1736_s22 }
   0xb   :  { %p1743_p6 = por %p1742_p5, %p1741_p4 }
   0xd   :  { %p1744_p7 = pnand %p1743_p6, %p1737_p3 }
   0xf   :  { %1747 = shalt.err (!%p1744_p7)
}
  0x10   :  { %s1775_s23 = smov 64   ;;  %s1776_s24 = smov 4  }
  0x11   :  { %48 = dma.hbm_to_vmem [thread:$0]  %s2177_s8, 256, %s43_s30, [#allocation3], %s1775_s23, %s1775_s23, %s1776_s24  }
  0x12   :  { %1770 = dma.done.wait [#allocation3], 256  }
  0x13   :  { %1771 = vsyncadd [#allocation3], 4294967040  ;;  %v1777_v0 = vmov 0.0   ;;  %vm1778_vm0 = vmmov 0   ;;  %v1676_v1 = vld [vmem:[%s2171_s2] sm:$0xff]   ;;  %v1677_v2 = vld [vmem:[%s2171_s2 + $0x8] sm:$0xff]  }
  0x14   :  { %1530 = vmatprep.subr.bf16.mxu0 %v1777_v0  ;;  %1534 = vmatprep.mubr.msk.bf16.mxu0 %vm1778_vm0, %v1777_v0  ;;  %v1892_v3 = vld [vmem:[%s2169_s0] sm:$0xff]  ;;  %v1897_v4 = vld [vmem:[%s2169_s0 + $0x8] sm:$0xff]  ;;  %vm89_vm1 = vcmask 261120   ;;  %s1779_s0 = smov 112   ;;  %s1780_s19 = smov 120   ;;  %vm154_vm2 = vcmask 64512  }
  0x15   :  { %1538 = vmatprep.subr.bf16.mxu1 %v1777_v0  ;;  %1540 = vmatprep.mubr.msk.bf16.mxu1 %vm1778_vm0, %v1777_v0  ;;  %v65_v5 = vpack.c.bf16 %v1897_v4, %v1892_v3  ;;  %v1433_v6 = vld [vmem:[%s2172_s3] ss:$0 sm:$0xff]  ;;  %s1781_s20 = smov 104   ;;  %s1782_s3 = smov 96   ;;  %vm672_vm3 = vcmask 1043456   ;;  %vm1084_vm4 = vcmask 130048  }
  0x16   :  { %1531 = vmatpush3.bf16.msra.mxu0 %v1676_v1  ;;  %v1453_v45 = vld [vmem:[%s2170_s1] ss:$0 sm:$0xff]  ;;  %v1454_v46 = vld [vmem:[%s2170_s1 + $0x1] ss:$0 sm:$0xff]  ;;  %s1783_s1 = smov 8   ;;  %s1784_s8 = smov 16  }
  0x17   :  { %1532 = vmatprep.subr.bf16.mxu0 %v1777_v0  ;;  %s1785_s29 = smov 24   ;;  %vm1089_vm5 = vcmask 195584   ;;  %vm1323_vm6 = vcmask 523264   ;;  %s1786_s26 = smov [#allocation5]  }
  0x18   :  { %s1421_s27 = sshll.u32 %s1786_s26, 4  ;;  %s1422_s27 = int_to_ptr.vmem [resolvable:$true] %s1421_s27 }
  0x19   :  { %s1748_s28 = scalar_lea.vmem %s1422_s27, 256  ;;  %p1753_p9 = scmp.lt.s32.totalorder %s1422_s27, %s1422_s27 }
  0x1a   :  { %1533 = vmatpush3.bf16.msra.mxu0 %v1677_v2  ;;  %p1749_p8 = scmp.ne.s32.totalorder %s1422_s27, %s1748_s28  ;;  %p1754_p10 = scmp.lt.s32.totalorder %s1748_s28, %s1748_s28 }
  0x1b   :  { %1544 = vmatprep.subr.bf16.mxu0 %v1777_v0 }
  0x1c   :  { %p1755_p11 = por %p1754_p10, %p1753_p9 }
  0x1d   :  { %1535 = vmatmul.mubr.msk.bf16.vlgmr.msra.gmra.mrb[0].mxu0 %vm89_vm1, %v65_v5 }
  0x1e   :  { %1546 = vmatprep.mubr.msk.bf16.mxu0 %vm1778_vm0, %v1777_v0  ;;  %p1756_p12 = pnand %p1755_p11, %p1749_p8 }
  0xf0   :  { %v127_v7 = vpop.f32.mrb[0].mxu0 }
  0xf1   :  { %v128_v8 = vadd.f32 %v1433_v6, %v127_v7  ;;  %v1536_v9 = vpop.f32.mrb[1].mxu0 }
  0xf2   :  { %v130_v10 = vpop.f32.mrb[2].mxu0 }
  0xf3   :  { %v1482_v11 = vpack.c.bf16 %v128_v8, %v128_v8  ;;  %v131_v12 = vadd.f32 %v1433_v6, %v130_v10  ;;  %v1537_v13 = vpop.f32.mrb[3].mxu0 }
  0xf5   :  { %144 = vrot.lane.b32.xlu1 %v1482_v11, %s1779_s0  ;;  %140 = vrot.lane.b32.xlu0 %v1482_v11, %s1780_s19  ;;  %v1909_v14 = vpack.c.bf16 %v131_v12, %v131_v12 }
  0xf9   :  { %146 = vrot.lane.b32.xlu1 %v1909_v14, %s1779_s0  ;;  %142 = vrot.lane.b32.xlu0 %v1909_v14, %s1780_s19 }
  0xfd   :  { %150 = vrot.lane.b32.xlu1 %v1909_v14, %s1781_s20  ;;  %148 = vrot.lane.b32.xlu0 %v1482_v11, %s1781_s20 }
 0x101   :  { %201 = vrot.lane.b32.xlu1 %v1909_v14, %s1782_s3  ;;  %152 = vrot.lane.b32.xlu0 %v1482_v11, %s1782_s3 }
 0x167   :  { %v145_v15 = vpop.permute.xlu1 %144  ;;  %v141_v16 = vpop.permute.xlu0 %140 }
 0x168   :  { %v1915_v17 = vcombine.low %v141_v16, %v141_v16  ;;  %v1918_v20 = vcombine.low %v145_v15, %v145_v15 }
 0x16a   :  { %251 = vrot.lane.b32.xlu0 %v1915_v17, %s1782_s3 }
 0x16b   :  { %v147_v18 = vpop.permute.xlu1 %146  ;;  %v143_v19 = vpop.permute.xlu0 %142 }
 0x16c   :  { %v1920_v21 = vcombine.low %v143_v19, %v143_v19  ;;  %v1924_v24 = vcombine.low %v147_v18, %v147_v18 }
 0x16e   :  { %351 = vrot.lane.b32.xlu0 %v1918_v20, %s1782_s3  ;;  %301 = vrot.lane.b32.xlu1 %v1920_v21, %s1782_s3 }
 0x16f   :  { %v151_v22 = vpop.permute.xlu1 %150  ;;  %v149_v23 = vpop.permute.xlu0 %148 }
 0x170   :  { %v1926_v25 = vcombine.low %v149_v23, %v149_v23  ;;  %v1930_v28 = vcombine.low %v151_v22, %v151_v22 }
 0x172   :  { %401 = vrot.lane.b32.xlu1 %v1924_v24, %s1782_s3  ;;  %451 = vrot.lane.b32.xlu0 %v1926_v25, %s1782_s3 }
 0x173   :  { %v202_v26 = vpop.permute.xlu1 %201  ;;  %v153_v27 = vpop.permute.xlu0 %152 }
 0x174   :  { %v207_v29 = vsel %vm154_vm2, %v202_v26, 0  ;;  %v159_v30 = vsel %vm154_vm2, %v153_v27, 0 }
 0x175   :  { %1539 = vmatpush3.bf16.xpose.msra.mxu1 %v159_v30  ;;  %1545 = vmatpush3.bf16.xpose.msra.mxu0 %v207_v29 }
 0x176   :  { %501 = vrot.lane.b32.xlu1 %v1930_v28, %s1782_s3  ;;  %1550 = vmatprep.subr.bf16.mxu1 %v1777_v0 }
 0x177   :  { %1556 = vmatprep.subr.bf16.mxu0 %v1777_v0 }
 0x17a   :  { %667 = vrot.lane.b32.xlu1 %v1482_v11, %s1775_s23 }
 0x17c   :  { %1541 = vmatmul.mubr.msk.bf16.vlgmr.msra.gmra.mrb[0].mxu1 %vm154_vm2, %v1482_v11  ;;  %1547 = vmatmul.mubr.msk.bf16.vlgmr.msra.gmra.mrb[4].mxu0 %vm154_vm2, %v1909_v14 }
 0x17d   :  { %1552 = vmatprep.mubr.msk.bf16.mxu1 %vm1778_vm0, %v1777_v0  ;;  %1558 = vmatprep.mubr.msk.bf16.mxu0 %vm1778_vm0, %v1777_v0 }
 0x1dc   :  { %v252_v31 = vpop.permute.xlu0 %251 }
 0x1dd   :  { %v257_v32 = vsel %vm154_vm2, %v252_v31, 0 }
 0x1de   :  { %1551 = vmatpush3.bf16.xpose.msra.mxu1 %v257_v32 }
 0x1df   :  { %1562 = vmatprep.subr.bf16.mxu1 %v1777_v0 }
 0x1e0   :  { %v302_v33 = vpop.permute.xlu1 %301  ;;  %v352_v35 = vpop.permute.xlu0 %351 }
 0x1e1   :  { %v307_v34 = vsel %vm154_vm2, %v302_v33, 0  ;;  %v357_v36 = vsel %vm154_vm2, %v352_v35, 0 }
 0x1e2   :  { %1557 = vmatpush3.bf16.xpose.msra.mxu0 %v307_v34 }
 0x1e3   :  { %1568 = vmatprep.subr.bf16.mxu0 %v1777_v0 }
 0x1e4   :  { %v402_v37 = vpop.permute.xlu1 %401  ;;  %v452_v39 = vpop.permute.xlu0 %451 }
 0x1e5   :  { %1553 = vmatmul.mubr.msk.bf16.vlgmr.msra.gmra.mrb[4].mxu1 %vm154_vm2, %v141_v16  ;;  %v407_v38 = vsel %vm154_vm2, %v402_v37, 0  ;;  %v457_v41 = vsel %vm154_vm2, %v452_v39, 0 }
 0x1e6   :  { %1563 = vmatpush3.bf16.xpose.msra.mxu1 %v357_v36  ;;  %1564 = vmatprep.mubr.msk.bf16.mxu1 %vm1778_vm0, %v1777_v0 }
 0x1e7   :  { %1574 = vmatprep.subr.bf16.mxu1 %v1777_v0 }
 0x1e8   :  { %v502_v40 = vpop.permute.xlu1 %501 }
 0x1e9   :  { %1559 = vmatmul.mubr.msk.bf16.vlgmr.msra.gmra.mrb[8].mxu0 %vm154_vm2, %v143_v19  ;;  %v507_v42 = vsel %vm154_vm2, %v502_v40, 0 }
 0x1ea   :  { %1569 = vmatpush3.bf16.xpose.msra.mxu0 %v407_v38  ;;  %1570 = vmatprep.mubr.msk.bf16.mxu0 %vm1778_vm0, %v1777_v0 }
 0x1eb   :  { %1580 = vmatprep.subr.bf16.mxu0 %v1777_v0 }
 0x1ec   :  { %v668_v43 = vpop.permute.xlu1 %667 }
 0x1ed   :  { %1565 = vmatmul.mubr.msk.bf16.vlgmr.msra.gmra.mrb[8].mxu1 %vm154_vm2, %v145_v15  ;;  %v674_v44 = vsel %vm672_vm3, %v668_v43, 0 }
 0x1ee   :  { %1575 = vmatpush3.bf16.xpose.msra.mxu1 %v457_v41  ;;  %1576 = vmatprep.mubr.msk.bf16.mxu1 %vm1778_vm0, %v1777_v0 }
 0x1ef   :  { %1586 = vmatprep.subr.bf16.mxu1 %v1777_v0 }
 0x1f1   :  { %1571 = vmatmul.mubr.msk.bf16.vlgmr.msra.gmra.mrb[12].mxu0 %vm154_vm2, %v147_v18 }
 0x1f2   :  { %1581 = vmatpush3.bf16.xpose.msra.mxu0 %v507_v42  ;;  %1582 = vmatprep.mubr.msk.bf16.mxu0 %vm1778_vm0, %v1777_v0 }
 0x1f3   :  { %1592 = vmatprep.subr.bf16.mxu0 %v1777_v0 }
 0x1f5   :  { %1577 = vmatmul.mubr.msk.bf16.vlgmr.msra.gmra.mrb[12].mxu1 %vm154_vm2, %v149_v23 }
 0x1f6   :  { %1587 = vmatpush3.bf16.msra.mxu1 %v674_v44  ;;  %1588 = vmatprep.mubr.msk.bf16.mxu1 %vm1778_vm0, %v1777_v0 }
 0x1f7   :  { %1598 = vmatprep.subr.bf16.mxu1 %v1777_v0 }
 0x1f9   :  { %1583 = vmatmul.mubr.msk.bf16.vlgmr.msra.gmra.mrb[16].mxu0 %vm154_vm2, %v151_v22 }
 0x1fa   :  { %1594 = vmatprep.mubr.msk.bf16.mxu0 %vm1778_vm0, %v1777_v0 }
 0x24f   :  { %v195_v47 = vpop.f32.mrb[0].mxu1  ;;  %v243_v48 = vpop.f32.mrb[4].mxu0 }
 0x250   :  { %v563_v49 = vadd.f32 %v1453_v45, %v195_v47  ;;  %v564_v50 = vadd.f32 %v1454_v46, %v243_v48  ;;  %v1542_v51 = vpop.f32.mrb[1].mxu1  ;;  %v1548_v52 = vpop.f32.mrb[5].mxu0 }
 0x251   :  { %v198_v53 = vpop.f32.mrb[2].mxu1  ;;  %v246_v54 = vpop.f32.mrb[6].mxu0 }
 0x252   :  { %v1543_v55 = vpop.f32.mrb[3].mxu1  ;;  %v1549_v56 = vpop.f32.mrb[7].mxu0  ;;  %v571_v57 = vsel %vm154_vm2, %v563_v49, -inf  ;;  %v574_v58 = vsel %vm154_vm2, %v564_v50, -inf }
 0x253   :  { %572 = vmax.xlane.f32.xlu0 %v571_v57  ;;  %575 = vmax.xlane.f32.xlu1 %v574_v58 }
 0x2b8   :  { %v293_v59 = vpop.f32.mrb[4].mxu1 }
 0x2b9   :  { %v565_v60 = vadd.f32 %v1453_v45, %v293_v59  ;;  %v1554_v61 = vpop.f32.mrb[5].mxu1 }
 0x2ba   :  { %v296_v62 = vpop.f32.mrb[6].mxu1 }
 0x2bb   :  { %v1555_v63 = vpop.f32.mrb[7].mxu1  ;;  %v577_v1 = vsel %vm154_vm2, %v565_v60, -inf }
 0x2bc   :  { %578 = vmax.xlane.f32.xlu0 %v577_v1  ;;  %v343_v2 = vpop.f32.mrb[8].mxu0 }
 0x2bd   :  { %v566_v5 = vadd.f32 %v1454_v46, %v343_v2  ;;  %v1560_v6 = vpop.f32.mrb[9].mxu0 }
 0x2be   :  { %v346_v7 = vpop.f32.mrb[10].mxu0 }
 0x2bf   :  { %v1561_v8 = vpop.f32.mrb[11].mxu0  ;;  %v580_v9 = vsel %vm154_vm2, %v566_v5, -inf }
 0x2c0   :  { %v393_v10 = vpop.f32.mrb[8].mxu1  ;;  %581 = vmax.xlane.f32.xlu0 %v580_v9 }
 0x2c1   :  { %v1987_v11 = vadd.f32 %v1453_v45, %v393_v10  ;;  %v1566_v12 = vpop.f32.mrb[9].mxu1 }
 0x2c2   :  { %v396_v13 = vpop.f32.mrb[10].mxu1 }
 0x2c3   :  { %v1567_v15 = vpop.f32.mrb[11].mxu1  ;;  %v583_v16 = vsel %vm154_vm2, %v1987_v11, -inf }
 0x2c4   :  { %584 = vmax.xlane.f32.xlu1 %v583_v16  ;;  %v443_v18 = vpop.f32.mrb[12].mxu0 }
 0x2c5   :  { %v1991_v19 = vadd.f32 %v1454_v46, %v443_v18  ;;  %v1572_v22 = vpop.f32.mrb[13].mxu0 }
 0x2c6   :  { %v446_v23 = vpop.f32.mrb[14].mxu0 }
 0x2c7   :  { %v1573_v26 = vpop.f32.mrb[15].mxu0  ;;  %v586_v27 = vsel %vm154_vm2, %v1991_v19, -inf }
 0x2c8   :  { %v493_v29 = vpop.f32.mrb[12].mxu1  ;;  %587 = vmax.xlane.f32.xlu0 %v586_v27 }
 0x2c9   :  { %v569_v30 = vadd.f32 %v1453_v45, %v493_v29  ;;  %v1578_v31 = vpop.f32.mrb[13].mxu1 }
 0x2ca   :  { %v496_v32 = vpop.f32.mrb[14].mxu1 }
 0x2cb   :  { %v1579_v33 = vpop.f32.mrb[15].mxu1  ;;  %v589_v34 = vsel %vm154_vm2, %v569_v30, -inf }
 0x2cc   :  { %590 = vmax.xlane.f32.xlu1 %v589_v34  ;;  %v543_v35 = vpop.f32.mrb[16].mxu0 }
 0x2cd   :  { %v570_v36 = vadd.f32 %v1454_v46, %v543_v35  ;;  %v1584_v37 = vpop.f32.mrb[17].mxu0 }
 0x2ce   :  { %v546_v38 = vpop.f32.mrb[18].mxu0 }
 0x2cf   :  { %v1585_v39 = vpop.f32.mrb[19].mxu0  ;;  %v592_v40 = vsel %vm154_vm2, %v570_v36, -inf }
 0x2d0   :  { %593 = vmax.xlane.f32.xlu0 %v592_v40 }
 0x2dd   :  { %764 = vrot.lane.b32.xlu1 %v1915_v17, %s1775_s23 }
 0x2e0   :  { %v573_v41 = vpop.xlane.xlu0 %572  ;;  %v576_v42 = vpop.xlane.xlu1 %575 }
 0x2e1   :  { %812 = vrot.lane.b32.xlu1 %v1920_v21, %s1775_s23  ;;  %v595_v43 = vsub.f32 %v563_v49, %v573_v41  ;;  %v596_v44 = vsub.f32 %v564_v50, %v576_v42 }
 0x2e3   :  { %v603_v45 = vmul.f32 1.442695, %v595_v43  ;;  %v605_v46 = vmul.f32 1.442695, %v596_v44 }
 0x2e5   :  { %1686 = vpow2.f32 %v603_v45 }
 0x2e6   :  { %716 = vrot.lane.b32.xlu0 %v1909_v14, %s1775_s23  ;;  %1688 = vpow2.f32 %v605_v46 }
 0x2ef   :  { %v1687_v47 = vpop.eup %1686 }
 0x2f0   :  { %v1689_v48 = vpop.eup %1688  ;;  %v619_v51 = vsel %vm154_vm2, %v1687_v47, 0.0 }
 0x2f1   :  { %v622_v17 = vsel %vm154_vm2, %v1689_v48, 0.0 }
 0x305   :  { %620 = vadd.xlane.f32.xlu1 %v619_v51  ;;  %623 = vadd.xlane.f32.xlu0 %v622_v17 }
 0x349   :  { %v579_v21 = vpop.xlane.xlu0 %578 }
 0x34a   :  { %v597_v52 = vsub.f32 %v565_v60, %v579_v21 }
 0x34c   :  { %v607_v53 = vmul.f32 1.442695, %v597_v52 }
 0x34d   :  { %v582_v14 = vpop.xlane.xlu0 %581 }
 0x34e   :  { %1690 = vpow2.f32 %v607_v53  ;;  %v598_v54 = vsub.f32 %v566_v5, %v582_v14 }
 0x350   :  { %v609_v49 = vmul.f32 1.442695, %v598_v54 }
 0x351   :  { %v585_v62 = vpop.xlane.xlu1 %584 }
 0x352   :  { %1692 = vpow2.f32 %v609_v49  ;;  %v599_v63 = vsub.f32 %v1987_v11, %v585_v62 }
 0x354   :  { %v611_v5 = vmul.f32 1.442695, %v599_v63 }
 0x355   :  { %v588_v55 = vpop.xlane.xlu0 %587 }
 0x356   :  { %v600_v2 = vsub.f32 %v1991_v19, %v588_v55  ;;  %1694 = vpow2.f32 %v611_v5 }
 0x358   :  { %v2005_v50 = vpop.eup %1690  ;;  %v613_v7 = vmul.f32 1.442695, %v600_v2 }
 0x359   :  { %v625_v56 = vsel %vm154_vm2, %v2005_v50, 0.0  ;;  %v591_v1 = vpop.xlane.xlu1 %590 }
 0x35a   :  { %626 = vadd.xlane.f32.xlu1 %v625_v56  ;;  %v601_v6 = vsub.f32 %v569_v30, %v591_v1  ;;  %1696 = vpow2.f32 %v613_v7 }
 0x35c   :  { %v2009_v57 = vpop.eup %1692  ;;  %v615_v8 = vmul.f32 1.442695, %v601_v6 }
 0x35d   :  { %v594_v58 = vpop.xlane.xlu0 %593  ;;  %v628_v59 = vsel %vm154_vm2, %v2009_v57, 0.0  ;;  %v765_v12 = vpop.permute.xlu1 %764 }
 0x35e   :  { %629 = vadd.xlane.f32.xlu0 %v628_v59  ;;  %v602_v9 = vsub.f32 %v570_v36, %v594_v58  ;;  %1698 = vpow2.f32 %v615_v8  ;;  %v770_v34 = vsel %vm672_vm3, %v765_v12, 0 }
 0x360   :  { %v617_v10 = vmul.f32 1.442695, %v602_v9 }
 0x361   :  { %v717_v60 = vpop.permute.xlu0 %716  ;;  %v813_v13 = vpop.permute.xlu1 %812 }
 0x362   :  { %v722_v61 = vsel %vm672_vm3, %v717_v60, 0  ;;  %1700 = vpow2.f32 %v617_v10  ;;  %v818_v35 = vsel %vm672_vm3, %v813_v13, 0 }
 0x363   :  { %1593 = vmatpush3.bf16.msra.mxu0 %v722_v61 }
 0x364   :  { %1604 = vmatprep.subr.bf16.mxu0 %v1777_v0 }
 0x36b   :  { %908 = vrot.lane.b32.xlu1 %v1924_v24, %s1775_s23  ;;  %v2021_v24 = vpop.eup %1694 }
 0x36c   :  { %v631_v11 = vsel %vm154_vm2, %v2021_v24, 0.0 }
 0x374   :  { %860 = vrot.lane.b32.xlu0 %v1918_v20, %s1775_s23  ;;  %v2023_v20 = vpop.eup %1696 }
 0x375   :  { %v2027_v15 = vpop.eup %1698  ;;  %v634_v22 = vsel %vm154_vm2, %v2023_v20, 0.0 }
 0x376   :  { %v637_v19 = vsel %vm154_vm2, %v2027_v15, 0.0  ;;  %v2033_v23 = vpop.eup %1700 }
 0x377   :  { %v640_v26 = vsel %vm154_vm2, %v2033_v23, 0.0 }
 0x38f   :  { %632 = vadd.xlane.f32.xlu1 %v631_v11 }
 0x392   :  { %v621_v16 = vpop.xlane.xlu1 %620  ;;  %v624_v18 = vpop.xlane.xlu0 %623 }
 0x393   :  { %1702 = vrcp.f32 %v621_v16  ;;  %638 = vadd.xlane.f32.xlu1 %v637_v19  ;;  %635 = vadd.xlane.f32.xlu0 %v634_v22  ;;  %v1678_v22 = vld [vmem:[%s2173_s4] sm:$0xff]  }
 0x394   :  { %1704 = vrcp.f32 %v624_v18 }
 0x397   :  { %641 = vadd.xlane.f32.xlu0 %v640_v26 }
 0x39d   :  { %v1703_v27 = vpop.eup %1702 }
 0x39e   :  { %v1705_v29 = vpop.eup %1704  ;;  %v651_v30 = vmul.f32 %v1703_v27, %v1687_v47 }
 0x39f   :  { %v652_v31 = vmul.f32 %v1705_v29, %v1689_v48 }
 0x3a0   :  { %v659_v32 = vpack.c.bf16 %v651_v30, %v651_v30  ;;  %v1679_v30 = vld [vmem:[%s2173_s4 + $0x8] sm:$0xff]  }
 0x3a1   :  { %v660_v33 = vpack.c.bf16 %v652_v31, %v652_v31 }
 0x3a2   :  { %1589 = vmatmul.mubr.msk.bf16.vlgmr.msra.gmra.mrb[16].mxu1 %vm154_vm2, %v659_v32 }
 0x3a3   :  { %1595 = vmatmul.mubr.msk.bf16.vlgmr.msra.gmra.mrb[20].mxu0 %vm154_vm2, %v660_v33  ;;  %1599 = vmatpush3.bf16.msra.mxu1 %v770_v34 }
 0x3a4   :  { %1605 = vmatpush3.bf16.msra.mxu0 %v818_v35  ;;  %1004 = vrot.lane.b32.xlu1 %v1930_v28, %s1775_s23 }
 0x3a5   :  { %1600 = vmatprep.mubr.msk.bf16.mxu1 %vm1778_vm0, %v1777_v0  ;;  %1610 = vmatprep.subr.bf16.mxu1 %v1777_v0 }
 0x3a6   :  { %1606 = vmatprep.mubr.msk.bf16.mxu0 %vm1778_vm0, %v1777_v0  ;;  %1616 = vmatprep.subr.bf16.mxu0 %v1777_v0 }
 0x3ad   :  { %956 = vrot.lane.b32.xlu0 %v1926_v25, %s1775_s23 }
 0x3e7   :  { %v627_v36 = vpop.xlane.xlu1 %626 }
 0x3e8   :  { %1706 = vrcp.f32 %v627_v36 }
 0x3eb   :  { %v630_v37 = vpop.xlane.xlu0 %629  ;;  %v909_v44 = vpop.permute.xlu1 %908 }
 0x3ec   :  { %1708 = vrcp.f32 %v630_v37  ;;  %v914_v45 = vsel %vm672_vm3, %v909_v44, 0 }
 0x3ef   :  { %v861_v39 = vpop.permute.xlu0 %860 }
 0x3f0   :  { %v866_v43 = vsel %vm672_vm3, %v861_v39, 0 }
 0x3f2   :  { %v1707_v38 = vpop.eup %1706 }
 0x3f3   :  { %v653_v28 = vmul.f32 %v1707_v38, %v2005_v50 }
 0x3f5   :  { %v661_v40 = vpack.c.bf16 %v653_v28, %v653_v28 }
 0x3f6   :  { %v1709_v41 = vpop.eup %1708 }
 0x3f7   :  { %v654_v42 = vmul.f32 %v1709_v41, %v2009_v57  ;;  %1601 = vmatmul.mubr.msk.bf16.vlgmr.msra.gmra.mrb[20].mxu1 %vm154_vm2, %v661_v40 }
 0x3f8   :  { %1611 = vmatpush3.bf16.msra.mxu1 %v866_v43  ;;  %1612 = vmatprep.mubr.msk.bf16.mxu1 %vm1778_vm0, %v1777_v0 }
 0x3f9   :  { %v662_v25 = vpack.c.bf16 %v654_v42, %v654_v42  ;;  %1622 = vmatprep.subr.bf16.mxu1 %v1777_v0 }
 0x3fb   :  { %1607 = vmatmul.mubr.msk.bf16.vlgmr.msra.gmra.mrb[24].mxu0 %vm154_vm2, %v662_v25 }
 0x3fc   :  { %1617 = vmatpush3.bf16.msra.mxu0 %v914_v45  ;;  %1618 = vmatprep.mubr.msk.bf16.mxu0 %vm1778_vm0, %v1777_v0 }
 0x3fd   :  { %1628 = vmatprep.subr.bf16.mxu0 %v1777_v0 }
 0x41c   :  { %v633_v46 = vpop.xlane.xlu1 %632 }
 0x41d   :  { %1710 = vrcp.f32 %v633_v46 }
 0x420   :  { %v639_v47 = vpop.xlane.xlu1 %638  ;;  %v636_v48 = vpop.xlane.xlu0 %635 }
 0x421   :  { %1712 = vrcp.f32 %v639_v47 }
 0x422   :  { %1714 = vrcp.f32 %v636_v48 }
 0x424   :  { %v642_v51 = vpop.xlane.xlu0 %641  ;;  %v1005_v56 = vpop.permute.xlu1 %1004 }
 0x425   :  { %1716 = vrcp.f32 %v642_v51  ;;  %v1010_v59 = vsel %vm672_vm3, %v1005_v56, 0 }
 0x427   :  { %v1711_v17 = vpop.eup %1710 }
 0x428   :  { %v655_v21 = vmul.f32 %v1711_v17, %v2021_v24  ;;  %v957_v52 = vpop.permute.xlu0 %956 }
 0x429   :  { %v962_v49 = vsel %vm672_vm3, %v957_v52, 0 }
 0x42a   :  { %v663_v53 = vpack.c.bf16 %v655_v21, %v655_v21 }
 0x42b   :  { %v1713_v14 = vpop.eup %1712 }
 0x42c   :  { %v1715_v54 = vpop.eup %1714  ;;  %1613 = vmatmul.mubr.msk.bf16.vlgmr.msra.gmra.mrb[24].mxu1 %vm154_vm2, %v663_v53  ;;  %v657_v55 = vmul.f32 %v1713_v14, %v2027_v15 }
 0x42d   :  { %v656_v50 = vmul.f32 %v1715_v54, %v2023_v20  ;;  %1623 = vmatpush3.bf16.msra.mxu1 %v962_v49  ;;  %1624 = vmatprep.mubr.msk.bf16.mxu1 %vm1778_vm0, %v1777_v0 }
 0x42e   :  { %1634 = vmatprep.subr.bf16.mxu1 %v1777_v0  ;;  %v665_v60 = vpack.c.bf16 %v657_v55, %v657_v55 }
 0x42f   :  { %v664_v57 = vpack.c.bf16 %v656_v50, %v656_v50  ;;  %v1717_v58 = vpop.eup %1716 }
 0x430   :  { %v658_v61 = vmul.f32 %v1717_v58, %v2033_v23 }
 0x431   :  { %1619 = vmatmul.mubr.msk.bf16.vlgmr.msra.gmra.mrb[28].mxu0 %vm154_vm2, %v664_v57  ;;  %v1463_v57 = vld [vmem:[%s2174_s5] ss:$0 sm:$0xff] }
 0x432   :  { %1629 = vmatpush3.bf16.msra.mxu0 %v1010_v59  ;;  %1630 = vmatprep.mubr.msk.bf16.mxu0 %vm1778_vm0, %v1777_v0  ;;  %v666_v62 = vpack.c.bf16 %v658_v61, %v658_v61 }
 0x433   :  { %1642 = vmatprep.subr.bf16.mxu0 %v1777_v0 }
 0x434   :  { %1625 = vmatmul.mubr.msk.bf16.vlgmr.msra.gmra.mrb[28].mxu1 %vm154_vm2, %v665_v60 }
 0x435   :  { %1638 = vmatprep.mubr.msk.bf16.mxu1 %vm1778_vm0, %v1777_v0  ;;  %1635 = vmatpush3.bf16.msra.mxu1 %v1678_v22 }
 0x436   :  { %1636 = vmatprep.subr.bf16.mxu1 %v1777_v0 }
 0x439   :  { %1631 = vmatmul.mubr.msk.bf16.vlgmr.msra.gmra.mrb[32].mxu0 %vm154_vm2, %v666_v62  ;;  %1637 = vmatpush3.bf16.msra.mxu1 %v1679_v30 }
 0x43a   :  { %1646 = vmatprep.mubr.msk.bf16.mxu0 %vm1778_vm0, %v1777_v0  ;;  %1650 = vmatprep.subr.bf16.mxu1 %v1777_v0 }
 0x475   :  { %v2083_v63 = vpop.f32.mrb[16].mxu1 }
 0x476   :  { %v2085_v1 = vpop.f32.mrb[20].mxu0  ;;  %v1590_v2 = vpop.f32.mrb[17].mxu1  ;;  %v1052_v51 = vpack.c.bf16 %v2083_v63, %v2083_v63 }
 0x477   :  { %v1596_v5 = vpop.f32.mrb[21].mxu0  ;;  %v713_v6 = vpop.f32.mrb[18].mxu1  ;;  %v1053_v17 = vpack.c.bf16 %v2085_v1, %v2085_v1 }
 0x478   :  { %v761_v7 = vpop.f32.mrb[22].mxu0  ;;  %v1591_v8 = vpop.f32.mrb[19].mxu1 }
 0x479   :  { %v1597_v9 = vpop.f32.mrb[23].mxu0 }
 0x4ca   :  { %v806_v10 = vpop.f32.mrb[20].mxu1 }
 0x4cb   :  { %v1054_v12 = vpack.c.bf16 %v806_v10, %v806_v10  ;;  %v1602_v24 = vpop.f32.mrb[21].mxu1 }
 0x4cc   :  { %v809_v20 = vpop.f32.mrb[22].mxu1 }
 0x4cd   :  { %v1603_v13 = vpop.f32.mrb[23].mxu1  ;;  %1062 = vrot.lane.b32.xlu0 %v1054_v12, %s1783_s1 }
 0x4ce   :  { %v854_v11 = vpop.f32.mrb[24].mxu0 }
 0x4cf   :  { %v1055_v15 = vpack.c.bf16 %v854_v11, %v854_v11  ;;  %v1608_v16 = vpop.f32.mrb[25].mxu0 }
 0x4d0   :  { %v857_v18 = vpop.f32.mrb[26].mxu0  ;;  %v1682_v16 = vld [vmem:[%s2179_s10] sm:$0xff]  }
 0x4d1   :  { %1064 = vrot.lane.b32.xlu1 %v1055_v15, %s1783_s1  ;;  %v1609_v19 = vpop.f32.mrb[27].mxu0  ;;  %v1680_v15 = vld [vmem:[#allocation2] sm:$0xff]   ;;  %v1683_v18 = vld [vmem:[%s2179_s10 + $0x8] sm:$0xff]  }
 0x4d2   :  { %1643 = vmatpush3.bf16.msra.mxu0 %v1680_v15  ;;  %v1481_v15 = vld [vmem:[%s2182_s13] ss:$0 sm:$0xff] }
 0x4d3   :  { %1644 = vmatprep.subr.bf16.mxu0 %v1777_v0 }
 0x4ff   :  { %v902_v23 = vpop.f32.mrb[24].mxu1 }
 0x500   :  { %v1056_v26 = vpack.c.bf16 %v902_v23, %v902_v23  ;;  %v1614_v27 = vpop.f32.mrb[25].mxu1 }
 0x501   :  { %v905_v29 = vpop.f32.mrb[26].mxu1 }
 0x502   :  { %1068 = vrot.lane.b32.xlu0 %v1056_v26, %s1784_s8  ;;  %v1615_v31 = vpop.f32.mrb[27].mxu1 }
 0x504   :  { %v950_v32 = vpop.f32.mrb[28].mxu0 }
 0x505   :  { %v1057_v33 = vpack.c.bf16 %v950_v32, %v950_v32  ;;  %v1620_v34 = vpop.f32.mrb[29].mxu0  ;;  %v1468_v32 = vld [vmem:[%s2175_s6] ss:$0 sm:$0xff] }
 0x506   :  { %v953_v35 = vpop.f32.mrb[30].mxu0 }
 0x507   :  { %1070 = vrot.lane.b32.xlu1 %v1057_v33, %s1784_s8  ;;  %v1621_v36 = vpop.f32.mrb[31].mxu0  ;;  %v998_v37 = vpop.f32.mrb[28].mxu1 }
 0x508   :  { %v1058_v38 = vpack.c.bf16 %v998_v37, %v998_v37  ;;  %v1626_v28 = vpop.f32.mrb[29].mxu1  ;;  %v1469_v36 = vld [vmem:[%s2176_s7] ss:$0 sm:$0xff] }
 0x509   :  { %v1001_v39 = vpop.f32.mrb[30].mxu1 }
 0x50a   :  { %1074 = vrot.lane.b32.xlu0 %v1058_v38, %s1785_s29  ;;  %v1627_v40 = vpop.f32.mrb[31].mxu1 }
 0x50b   :  { %v1684_v40 = vld [vmem:[%s2179_s10 + $0x10] sm:$0xff]  }
 0x50c   :  { %v1046_v41 = vpop.f32.mrb[32].mxu0 }
 0x50d   :  { %v1059_v42 = vpack.c.bf16 %v1046_v41, %v1046_v41  ;;  %v1632_v43 = vpop.f32.mrb[33].mxu0  ;;  %v1685_v41 = vld [vmem:[%s2179_s10 + $0x18] sm:$0xff]  }
 0x50e   :  { %v1049_v44 = vpop.f32.mrb[34].mxu0 }
 0x50f   :  { %1076 = vrot.lane.b32.xlu1 %v1059_v42, %s1785_s29  ;;  %v1633_v25 = vpop.f32.mrb[35].mxu0  ;;  %v1470_v42 = vld [vmem:[%s2178_s9] ss:$0 sm:$0xff] }
 0x53f   :  { %v1063_v45 = vpop.permute.xlu0 %1062 }
 0x540   :  { %v1080_v52 = vsel %vm154_vm2, %v1052_v51, %v1063_v45 }
 0x543   :  { %v1065_v46 = vpop.permute.xlu1 %1064 }
 0x544   :  { %v1083_v53 = vsel %vm154_vm2, %v1053_v17, %v1065_v46 }
 0x574   :  { %v1069_v47 = vpop.permute.xlu0 %1068 }
 0x575   :  { %v1086_v14 = vsel %vm1084_vm4, %v1080_v52, %v1069_v47 }
 0x579   :  { %v1071_v48 = vpop.permute.xlu1 %1070 }
 0x57a   :  { %v1088_v54 = vsel %vm1084_vm4, %v1083_v53, %v1071_v48 }
 0x57c   :  { %v1075_v21 = vpop.permute.xlu0 %1074 }
 0x57d   :  { %v1091_v50 = vsel %vm1089_vm5, %v1086_v14, %v1075_v21 }
 0x581   :  { %v1077_v49 = vpop.permute.xlu1 %1076 }
 0x582   :  { %v1093_v55 = vsel %vm1089_vm5, %v1088_v54, %v1077_v49 }
 0x583   :  { %v1464_v56 = vcombine.low %v1091_v50, %v1093_v55 }
 0x585   :  { %1639 = vmatmul.mubr.msk.bf16.vlgmr.msra.gmra.mrb[32].mxu1 %vm89_vm1, %v1464_v56 }
 0x586   :  { %1658 = vmatprep.mubr.msk.bf16.mxu1 %vm1778_vm0, %v1777_v0  ;;  %1651 = vmatpush3.bf16.msra.mxu1 %v1682_v16 }
 0x587   :  { %1652 = vmatprep.subr.bf16.mxu1 %v1777_v0 }
 0x58a   :  { %1653 = vmatpush3.bf16.msra.mxu1 %v1683_v18 }
 0x58b   :  { %1654 = vmatprep.subr.bf16.mxu1 %v1777_v0 }
 0x58e   :  { %1655 = vmatpush3.bf16.msra.mxu1 %v1684_v40 }
 0x58f   :  { %1656 = vmatprep.subr.bf16.mxu1 %v1777_v0  ;;  %v1474_v0 = vld [vmem:[%s2180_s11] ss:$0 sm:$0xff] }
 0x592   :  { %1657 = vmatpush3.bf16.msra.mxu1 %v1685_v41 }
 0x658   :  { %v1159_v58 = vpop.f32.mrb[32].mxu1 }
 0x659   :  { %v1160_v59 = vadd.f32 %v1463_v57, %v1159_v58  ;;  %v1640_v60 = vpop.f32.mrb[33].mxu1 }
 0x65a   :  { %v1162_v61 = vpop.f32.mrb[34].mxu1 }
 0x65b   :  { %v1163_v62 = vadd.f32 %v1463_v57, %v1162_v61  ;;  %v1641_v63 = vpop.f32.mrb[35].mxu1  ;;  %v1166_v1 = vadd.f32 %v1160_v59, %v1892_v3 }
 0x65d   :  { %v1170_v2 = vsel %vm89_vm1, %v1166_v1, 0.0  ;;  %v1167_v5 = vadd.f32 %v1163_v62, %v1897_v4  ;;  %v1681_v4 = vld [vmem:[#allocation2 + $0x8] sm:$0xff]  }
 0x65e   :  { %1171 = vadd.xlane.f32.xlu0 %v1170_v2  ;;  %1645 = vmatpush3.bf16.msra.mxu0 %v1681_v4 }
 0x65f   :  { %v1173_v6 = vsel %vm89_vm1, %v1167_v5, 0.0 }
 0x660   :  { %1174 = vadd.xlane.f32.xlu1 %v1173_v6 }
 0x6eb   :  { %v1172_v7 = vpop.xlane.xlu0 %1171 }
 0x6ec   :  { %v1177_v8 = vmul.f32 0.03125, %v1172_v7 }
 0x6ed   :  { %v1175_v9 = vpop.xlane.xlu1 %1174 }
 0x6ee   :  { %v1179_v10 = vsub.f32 %v1166_v1, %v1177_v8  ;;  %v1178_v12 = vmul.f32 0.03125, %v1175_v9 }
 0x6f0   :  { %v1180_v24 = vsub.f32 %v1167_v5, %v1178_v12  ;;  %v1181_v20 = vmul.f32 %v1179_v10, %v1179_v10 }
 0x6f2   :  { %v1183_v13 = vsel %vm89_vm1, %v1181_v20, 0.0  ;;  %v1182_v11 = vmul.f32 %v1180_v24, %v1180_v24 }
 0x6f3   :  { %1184 = vadd.xlane.f32.xlu0 %v1183_v13  ;;  %v1480_v13 = vld [vmem:[%s2181_s12] ss:$0 sm:$0xff] }
 0x6f4   :  { %v1186_v3 = vsel %vm89_vm1, %v1182_v11, 0.0 }
 0x6f7   :  { %1187 = vadd.xlane.f32.xlu0 %v1186_v3 }
 0x780   :  { %v1185_v19 = vpop.xlane.xlu0 %1184 }
 0x781   :  { %v1189_v22 = vmul.f32 0.03125, %v1185_v19 }
 0x783   :  { %v1191_v23 = vadd.f32 1e-05, %v1189_v22 }
 0x784   :  { %v1188_v26 = vpop.xlane.xlu0 %1187 }
 0x785   :  { %1718 = vrsqrt.f32 %v1191_v23  ;;  %v1190_v27 = vmul.f32 0.03125, %v1188_v26 }
 0x787   :  { %v1192_v29 = vadd.f32 1e-05, %v1190_v27 }
 0x789   :  { %1720 = vrsqrt.f32 %v1192_v29 }
 0x78f   :  { %v1719_v30 = vpop.eup %1718 }
 0x790   :  { %v1195_v31 = vmul.f32 %v1719_v30, %v1179_v10 }
 0x792   :  { %v1203_v34 = vmul.f32 %v1468_v32, %v1195_v31 }
 0x793   :  { %v1721_v33 = vpop.eup %1720 }
 0x794   :  { %v1196_v35 = vmul.f32 %v1721_v33, %v1180_v24  ;;  %v1211_v38 = vadd.f32 %v1469_v36, %v1203_v34 }
 0x796   :  { %v1204_v37 = vmul.f32 %v1468_v32, %v1196_v35 }
 0x798   :  { %v1212_v28 = vadd.f32 %v1469_v36, %v1204_v37 }
 0x79a   :  { %v1213_v39 = vpack.c.bf16 %v1212_v28, %v1211_v38 }
 0x79c   :  { %1647 = vmatmul.mubr.msk.bf16.vlgmr.msra.gmra.mrb[36].mxu0 %vm89_vm1, %v1213_v39 }
 0x86f   :  { %v1274_v43 = vpop.f32.mrb[36].mxu0 }
 0x870   :  { %v1275_v44 = vadd.f32 %v1470_v42, %v1274_v43  ;;  %v1648_v25 = vpop.f32.mrb[37].mxu0 }
 0x871   :  { %v1277_v45 = vpop.f32.mrb[38].mxu0 }
 0x872   :  { %v1278_v46 = vadd.f32 %v1470_v42, %v1277_v45  ;;  %v1649_v47 = vpop.f32.mrb[39].mxu0  ;;  %v1281_v48 = vmax.f32 %v1275_v44, 0.0 }
 0x874   :  { %v1282_v51 = vmax.f32 %v1278_v46, 0.0 }
 0x876   :  { %v1283_v17 = vpack.c.bf16 %v1282_v51, %v1281_v48 }
 0x878   :  { %1659 = vmatmul.mubr.msk.bf16.vlgmr.msra.gmra.mrb[36].mxu1 %vm1323_vm6, %v1283_v17 }
 0x94b   :  { %v1361_v21 = vpop.f32.mrb[36].mxu1 }
 0x94c   :  { %v1362_v52 = vadd.f32 %v1474_v0, %v1361_v21  ;;  %v1660_v53 = vpop.f32.mrb[37].mxu1 }
 0x94d   :  { %v1364_v14 = vpop.f32.mrb[38].mxu1 }
 0x94e   :  { %v1365_v54 = vadd.f32 %v1474_v0, %v1364_v14  ;;  %v1661_v49 = vpop.f32.mrb[39].mxu1  ;;  %v1368_v50 = vadd.f32 %v1362_v52, %v1211_v38 }
 0x950   :  { %v1372_v55 = vsel %vm89_vm1, %v1368_v50, 0.0  ;;  %v1369_v56 = vadd.f32 %v1365_v54, %v1212_v28 }
 0x951   :  { %1373 = vadd.xlane.f32.xlu1 %v1372_v55 }
 0x952   :  { %v1375_v57 = vsel %vm89_vm1, %v1369_v56, 0.0 }
 0x953   :  { %1376 = vadd.xlane.f32.xlu0 %v1375_v57 }
 0x9de   :  { %v1374_v58 = vpop.xlane.xlu1 %1373 }
 0x9df   :  { %v1378_v59 = vmul.f32 0.03125, %v1374_v58 }
 0x9e0   :  { %v1377_v60 = vpop.xlane.xlu0 %1376 }
 0x9e1   :  { %v1380_v61 = vsub.f32 %v1368_v50, %v1378_v59  ;;  %v1379_v62 = vmul.f32 0.03125, %v1377_v60 }
 0x9e3   :  { %v1381_v63 = vsub.f32 %v1369_v56, %v1379_v62  ;;  %v1382_v1 = vmul.f32 %v1380_v61, %v1380_v61 }
 0x9e5   :  { %v1384_v2 = vsel %vm89_vm1, %v1382_v1, 0.0  ;;  %v1383_v5 = vmul.f32 %v1381_v63, %v1381_v63 }
 0x9e6   :  { %1385 = vadd.xlane.f32.xlu1 %v1384_v2 }
 0x9e7   :  { %v1387_v6 = vsel %vm89_vm1, %v1383_v5, 0.0 }
 0x9e8   :  { %1388 = vadd.xlane.f32.xlu0 %v1387_v6 }
 0xa73   :  { %v1386_v7 = vpop.xlane.xlu1 %1385 }
 0xa74   :  { %v1390_v8 = vmul.f32 0.03125, %v1386_v7 }
 0xa75   :  { %v1389_v9 = vpop.xlane.xlu0 %1388 }
 0xa76   :  { %v1392_v10 = vadd.f32 1e-05, %v1390_v8  ;;  %v1391_v12 = vmul.f32 0.03125, %v1389_v9 }
 0xa78   :  { %1722 = vrsqrt.f32 %v1392_v10  ;;  %v1393_v24 = vadd.f32 1e-05, %v1391_v12 }
 0xa7a   :  { %1724 = vrsqrt.f32 %v1393_v24 }
 0xa82   :  { %v1723_v20 = vpop.eup %1722 }
 0xa83   :  { %v1396_v11 = vmul.f32 %v1723_v20, %v1380_v61 }
 0xa84   :  { %v1725_v3 = vpop.eup %1724 }
 0xa85   :  { %v1404_v4 = vmul.f32 %v1480_v13, %v1396_v11  ;;  %v1397_v16 = vmul.f32 %v1725_v3, %v1381_v63 }
 0xa87   :  { %v1405_v18 = vmul.f32 %v1480_v13, %v1397_v16  ;;  %v1412_v19 = vadd.f32 %v1481_v15, %v1404_v4 }
 0xa89   :  { %v1413_v22 = vadd.f32 %v1481_v15, %v1405_v18  ;;  %1414 = vst.msk [vmem:[#allocation5] sm:$0xff] %vm89_vm1, %v1412_v19 }
 0xa8b   :  { %1415 = vst.msk [vmem:[#allocation5 + $0x8] sm:$0xff] %vm89_vm1, %v1413_v22 }
 0xa8c   :  { %1759 = shalt.err (!%p1756_p12)
}
 0xa8d   :  { %s1760_s8 = scalar_lea.hbm %s2183_s14, 256 }
 0xa8e   :  { %p1761_p13 = scmp.ne.s32.totalorder %s2183_s14, %s1760_s8  ;;  %p1764_p0 = scmp.lt.u32.totalorder %s1760_s8, %s2183_s14 }
 0xa90   :  { %p1766_p1 = pnand %p1764_p0, %p1761_p13 }
 0xa92   :  { %1769 = shalt.err (!%p1766_p1)
}
 0xa93   :  { %s1787_s15 = smov 128  }
 0xa94   :  { %1427 = dma.vmem_to_hbm [thread:$0]  %s1422_s27, 256, %s2183_s14, [#allocation4], %s1787_s15, %s1787_s15, %s1783_s1  }
 0xa95   :  { %1772 = dma.done.wait [#allocation4], 256  }
 0xa96   :  { %1773 = vsyncadd [#allocation4], 4294967040 }
 0xa97   :  { %1431 = vsyncpa [#allocation3], 1 }
 0xa98   :  { %1432 = vsyncpa [#allocation4], 1 }

</bundles_post_ra>
